<compile_context>
chip_gen: v6e
topology: v6e:2x2x1
jax: 0.10.0
libtpu: 0.0.40
codegen_flags: <defaults>
</compile_context>

<pallas_src>
import functools

import jax
import jax.numpy as jnp
from jax.experimental import pallas as pl
from jax.experimental.pallas import tpu as pltpu

EPS = 1e-5  # PyTorch BatchNorm1d default eps


# ---------------------------------------------------------------------------
# Fused Conv1d(k=3, s=1, p=1, no bias) + training-mode BatchNorm1d (+ReLU).
# Activations are (C, N*L); grid tiles the output channels.
# ---------------------------------------------------------------------------
def _conv_bn_kernel(x_ref, w_ref, g_ref, b_ref, o_ref, *, L, relu):
    """x_ref: (Cin, N*L); w_ref: (bc, 3*Cin); g/b: (bc, 1); o_ref: (bc, N*L)."""
    x = x_ref[...]
    cin, NL = x.shape
    # within-sample position of every lane (mask for the zero padding)
    pos = jax.lax.broadcasted_iota(jnp.int32, (1, NL), 1) % L
    zcol = jnp.zeros((cin, 1), x.dtype)
    left = jnp.concatenate([zcol, x[:, :-1]], axis=1)      # x[l-1]
    right = jnp.concatenate([x[:, 1:], zcol], axis=1)      # x[l+1]
    left = jnp.where(pos == 0, 0.0, left)                  # zero at sample starts
    right = jnp.where(pos == L - 1, 0.0, right)            # zero at sample ends
    xs = jnp.concatenate([left, x, right], axis=0)         # (3*Cin, N*L)

    # single MXU matmul instead of 3 small ones
    y = jnp.dot(w_ref[...], xs, preferred_element_type=jnp.float32)  # (bc, N*L)

    # BatchNorm1d (training mode): per-channel stats over all N*L positions
    m = jnp.mean(y, axis=1, keepdims=True)
    d = y - m
    v = jnp.mean(d * d, axis=1, keepdims=True)
    y = d * jax.lax.rsqrt(v + EPS) * g_ref[...] + b_ref[...]
    if relu:
        y = jnp.maximum(y, 0.0)
    o_ref[...] = y.astype(o_ref.dtype)


def conv_bn_relu(x_cnl, w, gamma, beta, *, L, relu):
    """x_cnl: (Cin, N*L), w: (Cout, Cin, 3) -> (Cout, N*L)."""
    cin, NL = x_cnl.shape
    cout = w.shape[0]
    # (Cout, Cin, 3) -> (Cout, 3*Cin), matching the [x_left; x; x_right] stack.
    w_cat = jnp.concatenate([w[:, :, 0], w[:, :, 1], w[:, :, 2]], axis=1)
    bc = 128 if (cout > 128 and cout % 128 == 0) else cout
    return pl.pallas_call(
        functools.partial(_conv_bn_kernel, L=L, relu=relu),
        out_shape=jax.ShapeDtypeStruct((cout, NL), x_cnl.dtype),
        grid=(cout // bc,),
        in_specs=[
            pl.BlockSpec((cin, NL), lambda c: (0, 0)),
            pl.BlockSpec((bc, 3 * cin), lambda c: (c, 0)),
            pl.BlockSpec((bc, 1), lambda c: (c, 0)),
            pl.BlockSpec((bc, 1), lambda c: (c, 0)),
        ],
        out_specs=pl.BlockSpec((bc, NL), lambda c: (c, 0)),
        compiler_params=pltpu.CompilerParams(dimension_semantics=("parallel",)),
    )(x_cnl, w_cat, gamma.reshape(cout, 1), beta.reshape(cout, 1))


# ---------------------------------------------------------------------------
# Shrinkage: statistics + fc + DownChannel -> per-sample threshold (C, N).
# ---------------------------------------------------------------------------
def _shrink_thr_kernel(x_ref, w1_ref, b1_ref, gf_ref, bf_ref, w2_ref, b2_ref,
                       wdg_ref, wdm_ref, bd_ref, thr_ref, *, N, L):
    x = x_ref[...]                                         # (C, N*L)
    nwin = max(L // 64, 1)
    gap_cols, map_cols = [], []
    for n in range(N):                                     # static, N is small
        xs = x[:, n * L:(n + 1) * L]                       # (C, L)
        gap_cols.append(jnp.mean(xs, axis=1, keepdims=True))
        acc = jnp.max(xs[:, 0:64], axis=1, keepdims=True)
        # TODO(synk): switch to lax.fori_loop for very large L (many windows).
        for w in range(1, nwin):
            acc = acc + jnp.max(xs[:, w * 64:(w + 1) * 64], axis=1, keepdims=True)
        map_cols.append(acc * (1.0 / nwin))
    gap = jnp.concatenate(gap_cols, axis=1)                # (C, N) GAP
    mgap = jnp.concatenate(map_cols, axis=1)               # (C, N) MaxPool(64)+GAP

    w1 = w1_ref[...]; b1 = b1_ref[...]
    gf = gf_ref[...]; bf = bf_ref[...]
    w2 = w2_ref[...]; b2 = b2_ref[...]

    def fc(v):                                             # v: (C, N), column = sample
        h = jnp.dot(w1, v, preferred_element_type=jnp.float32) + b1
        m = jnp.mean(h, axis=1, keepdims=True)             # BatchNorm1d over batch
        d = h - m
        var = jnp.mean(d * d, axis=1, keepdims=True)
        h = d * jax.lax.rsqrt(var + EPS) * gf + bf
        h = jnp.maximum(h, 0.0)
        h = jnp.dot(w2, h, preferred_element_type=jnp.float32) + b2
        return jax.nn.sigmoid(h)

    x_gap = gap * fc(gap)
    x_map = mgap * fc(mgap)
    # DownChannel(cat([x_gap, x_map])) == Wd[:, :C] @ x_gap + Wd[:, C:] @ x_map + bd
    thr = (jnp.dot(wdg_ref[...], x_gap, preferred_element_type=jnp.float32)
           + jnp.dot(wdm_ref[...], x_map, preferred_element_type=jnp.float32)
           + bd_ref[...])
    thr_ref[...] = thr.astype(thr_ref.dtype)


def shrink_threshold(x_cnl, p, *, N, L):
    C, NL = x_cnl.shape
    return pl.pallas_call(
        functools.partial(_shrink_thr_kernel, N=N, L=L),
        out_shape=jax.ShapeDtypeStruct((C, N), x_cnl.dtype),
    )(x_cnl,
      p["fc_w1"], p["fc_b1"].reshape(C, 1),
      p["fc_bn_g"].reshape(C, 1), p["fc_bn_b"].reshape(C, 1),
      p["fc_w2"], p["fc_b2"].reshape(C, 1),
      p["dc_w"][:, :C], p["dc_w"][:, C:], p["dc_b"].reshape(C, 1))


# ---------------------------------------------------------------------------
# Shrinkage: elementwise soft-threshold + residual add (gridded, pipelined).
# ---------------------------------------------------------------------------
def _soft_threshold_add(x, thr_col, res):
    sub = jnp.abs(x) - thr_col
    n_sub = jnp.maximum(sub, 0.0)
    sgn = jnp.where(x > 0, 1.0, jnp.where(x < 0, -1.0, 0.0)).astype(x.dtype)
    return sgn * n_sub + res


def _shrink_apply_tiled_kernel(x_ref, res_ref, thr_ref, o_ref):
    n = pl.program_id(0)                                   # sample index
    thr = thr_ref[...]                                     # (C, N)
    col = jax.lax.broadcasted_iota(jnp.int32, thr.shape, 1)
    thr_n = jnp.sum(jnp.where(col == n, thr, 0.0), axis=1, keepdims=True)  # (C, 1)
    o_ref[...] = _soft_threshold_add(x_ref[...], thr_n, res_ref[...]).astype(o_ref.dtype)


def _shrink_apply_whole_kernel(x_ref, res_ref, thr_ref, o_ref, *, N, L):
    thr = thr_ref[...]
    for n in range(N):                                     # fallback, static N
        sl = slice(n * L, (n + 1) * L)
        o_ref[:, sl] = _soft_threshold_add(
            x_ref[:, sl], thr[:, n:n + 1], res_ref[:, sl]).astype(o_ref.dtype)


def _lane_tile(L):
    for t in (2048, 1024, 512, 256, 128):
        if L % t == 0:
            return t
    return None


def shrink_apply(x_cnl, res_cnl, thr, *, N, L):
    C, NL = x_cnl.shape
    LT = _lane_tile(L)
    if LT is None:
        # TODO(synk): lane-tiling for L not a multiple of 128 (single-block fallback).
        return pl.pallas_call(
            functools.partial(_shrink_apply_whole_kernel, N=N, L=L),
            out_shape=jax.ShapeDtypeStruct((C, NL), x_cnl.dtype),
        )(x_cnl, res_cnl, thr)
    nlt = L // LT
    act = pl.BlockSpec((C, LT), lambda n, l: (0, n * nlt + l))
    return pl.pallas_call(
        _shrink_apply_tiled_kernel,
        out_shape=jax.ShapeDtypeStruct((C, NL), x_cnl.dtype),
        grid=(N, nlt),
        in_specs=[act, act, pl.BlockSpec((C, N), lambda n, l: (0, 0))],
        out_specs=act,
        compiler_params=pltpu.CompilerParams(
            dimension_semantics=("parallel", "parallel")),
    )(x_cnl, res_cnl, thr)


# ---------------------------------------------------------------------------
# Module composition (glue) — activations stay in (C, N*L) throughout.
# ---------------------------------------------------------------------------
def nrrb_forward(x_cnl, p, *, N, L):
    y = conv_bn_relu(x_cnl, p["conv_w"], p["bn_g"], p["bn_b"], L=L, relu=True)
    residual = y
    y = conv_bn_relu(y, p["conv_w"], p["bn_g"], p["bn_b"], L=L, relu=True)
    thr = shrink_threshold(y, p["shr"], N=N, L=L)
    return shrink_apply(y, residual, thr, N=N, L=L)


def basic_block2_forward(x, p):
    """x: (N, Cin, L) float32 -> (N, 2*out_channel, L)."""
    N, cin, L = x.shape
    xc = jnp.transpose(x, (1, 0, 2)).reshape(cin, N * L)   # fold batch -> lanes (once)
    out = conv_bn_relu(xc, p["conv1_w"], p["bn1_g"], p["bn1_b"], L=L, relu=False)
    out = nrrb_forward(out, p["nrrb1"], N=N, L=L)
    out = conv_bn_relu(out, p["conv2_w"], p["bn2_g"], p["bn2_b"], L=L, relu=False)
    out = nrrb_forward(out, p["nrrb2"], N=N, L=L)
    c2 = out.shape[0]
    return jnp.transpose(out.reshape(c2, N, L), (1, 0, 2))


# ---------------------------------------------------------------------------
# Deterministic parameter init (shapes per the PyTorch module __init__).
# TODO(synk): BatchNorm running-stat updates (training side effect) are not
# modeled; only the forward output (batch statistics) is reproduced.
# ---------------------------------------------------------------------------
def init_params(key, in_channel, out_channel):
    keys = iter(jax.random.split(key, 64))

    def nrm(shape, scale=0.2):
        return scale * jax.random.normal(next(keys), shape, jnp.float32)

    def bn_pair(c):
        g = 1.0 + 0.1 * jax.random.normal(next(keys), (c,), jnp.float32)
        b = 0.1 * jax.random.normal(next(keys), (c,), jnp.float32)
        return g, b

    def shr(c):
        gf, bf = bn_pair(c)
        return {"fc_w1": nrm((c, c)), "fc_b1": nrm((c,), 0.1),
                "fc_bn_g": gf, "fc_bn_b": bf,
                "fc_w2": nrm((c, c)), "fc_b2": nrm((c,), 0.1),
                "dc_w": nrm((c, 2 * c)), "dc_b": nrm((c,), 0.1)}

    def nrrb(c):
        g, b = bn_pair(c)
        return {"conv_w": nrm((c, c, 3)), "bn_g": g, "bn_b": b, "shr": shr(c)}

    g1, b1 = bn_pair(out_channel)
    g2, b2 = bn_pair(2 * out_channel)
    return {"conv1_w": nrm((out_channel, in_channel, 3)),
            "bn1_g": g1, "bn1_b": b1,
            "nrrb1": nrrb(out_channel),
            "conv2_w": nrm((2 * out_channel, out_channel, 3)),
            "bn2_g": g2, "bn2_b": b2,
            "nrrb2": nrrb(2 * out_channel)}


# ---------------------------------------------------------------------------
# Pure-JAX reference (same semantics) for a robust sanity check.
# ---------------------------------------------------------------------------
def _conv_ref(x, w):
    return jax.lax.conv_general_dilated(
        x, w, window_strides=(1,), padding=((1, 1),),
        dimension_numbers=("NCH", "OIH", "NCH"))


def _bn_ref(x, g, b, relu):
    m = jnp.mean(x, axis=(0, 2), keepdims=True)
    v = jnp.mean((x - m) ** 2, axis=(0, 2), keepdims=True)
    y = (x - m) / jnp.sqrt(v + EPS) * g.reshape(1, -1, 1) + b.reshape(1, -1, 1)
    return jnp.maximum(y, 0.0) if relu else y


def _shr_ref(x, p):
    N, C, L = x.shape
    x_abs = jnp.abs(x)
    gap = jnp.mean(x, axis=2)
    map_gap = jnp.mean(jnp.max(x.reshape(N, C, L // 64, 64), axis=3), axis=2)

    def fc(v):
        h = v @ p["fc_w1"].T + p["fc_b1"]
        m = jnp.mean(h, axis=0, keepdims=True)
        var = jnp.mean((h - m) ** 2, axis=0, keepdims=True)
        h = (h - m) / jnp.sqrt(var + EPS) * p["fc_bn_g"] + p["fc_bn_b"]
        h = jnp.maximum(h, 0.0)
        return jax.nn.sigmoid(h @ p["fc_w2"].T + p["fc_b2"])

    x_gap = gap * fc(gap)
    x_map = map_gap * fc(map_gap)
    x_all = jnp.concatenate([x_gap, x_map], axis=1)
    thr = x_all @ p["dc_w"].T + p["dc_b"]
    return jnp.sign(x) * jnp.maximum(x_abs - thr[:, :, None], 0.0)


def _nrrb_ref(x, p):
    y = _bn_ref(_conv_ref(x, p["conv_w"]), p["bn_g"], p["bn_b"], True)
    residual = y
    y = _bn_ref(_conv_ref(y, p["conv_w"]), p["bn_g"], p["bn_b"], True)
    return _shr_ref(y, p["shr"]) + residual


def basic_block2_ref(x, p):
    out = _bn_ref(_conv_ref(x, p["conv1_w"]), p["bn1_g"], p["bn1_b"], False)
    out = _nrrb_ref(out, p["nrrb1"])
    out = _bn_ref(_conv_ref(out, p["conv2_w"]), p["bn2_g"], p["bn2_b"], False)
    out = _nrrb_ref(out, p["nrrb2"])
    return out


if __name__ == "__main__":
    N, C_IN, C_OUT, L = 2, 4, 8, 128   # L >= 64 and L % 64 == 0 (MaxPool1d(64, 64))
    key = jax.random.PRNGKey(0)
    kx, kp = jax.random.split(key)
    x = jax.random.normal(kx, (N, C_IN, L), jnp.float32)
    params = init_params(kp, C_IN, C_OUT)

    fwd = jax.jit(basic_block2_forward)
    out = jax.block_until_ready(fwd(x, params))
    assert out.shape == (N, 2 * C_OUT, L), out.shape
    assert bool(jnp.all(jnp.isfinite(out)))

    ref = basic_block2_ref(x, params)
    diff = jnp.abs(out - ref)
    tol = 5e-2 + 5e-2 * jnp.abs(ref)
    # robust check (tolerates rare sign(x) flips for |x| ~ 0 and bf16 MXU rounding)
    frac_ok = float(jnp.mean((diff <= tol).astype(jnp.float32)))
    assert frac_ok > 0.99, (frac_ok, float(jnp.max(diff)))

    print("KERNEL_OK")
</pallas_src>

<mosaic_0001>
module attributes {stable_mosaic.version = 11 : i64} {
  func.func @_conv_bn_kernel(%arg0: i32, %arg1: memref<4x256xf32, #tpu.memory_space<vmem>>, %arg2: memref<8x12xf32, #tpu.memory_space<vmem>>, %arg3: memref<8x1xf32, #tpu.memory_space<vmem>>, %arg4: memref<8x1xf32, #tpu.memory_space<vmem>>, %arg5: memref<8x256xf32, #tpu.memory_space<vmem>>) attributes {dimension_semantics = [#tpu.dimension_semantics<parallel>], iteration_bounds = array<i64: 1>, scalar_prefetch = 0 : i64, scratch_operands = 0 : i64, tpu.core_type = #tpu.core_type<tc>, window_params = [{pipeline_mode = #tpu.pipeline_mode<synchronous>, transform_indices = @transform_0, window_bounds = array<i64: 4, 256>}, {transform_indices = @transform_1, window_bounds = array<i64: 8, 12>}, {transform_indices = @transform_2, window_bounds = array<i64: 8, 1>}, {transform_indices = @transform_3, window_bounds = array<i64: 8, 1>}, {transform_indices = @transform_4, window_bounds = array<i64: 8, 256>}]} {
    %c0 = arith.constant 0 : index
    %c0_0 = arith.constant 0 : index
    %0 = vector.load %arg1[%c0, %c0_0] : memref<4x256xf32, #tpu.memory_space<vmem>>, vector<4x256xf32>
    %1 = tpu.iota {dimensions = array<i32: 1>} : vector<1x256xi32>
    %c128_i32 = arith.constant 128 : i32
    %c0_i32 = arith.constant 0 : i32
    %2 = arith.cmpi eq, %c128_i32, %c0_i32 : i32
    %c1_i32 = arith.constant 1 : i32
    %3 = arith.select %2, %c1_i32, %c128_i32 : i32
    %4 = vector.broadcast %3 : i32 to vector<1x256xi32>
    %5 = arith.remsi %1, %4 : vector<1x256xi32>
    %c0_i32_1 = arith.constant 0 : i32
    %6 = vector.broadcast %c0_i32_1 : i32 to vector<1x256xi32>
    %7 = arith.cmpi ne, %5, %6 : vector<1x256xi32>
    %c0_i32_2 = arith.constant 0 : i32
    %8 = vector.broadcast %c0_i32_2 : i32 to vector<1x256xi32>
    %9 = arith.cmpi slt, %5, %8 : vector<1x256xi32>
    %c0_i32_3 = arith.constant 0 : i32
    %10 = arith.cmpi slt, %3, %c0_i32_3 : i32
    %11 = vector.broadcast %10 : i1 to vector<1x256xi1>
    %12 = vector.broadcast %11 : vector<1x256xi1> to vector<1x256xi1>
    %13 = arith.xori %9, %12 : vector<1x256xi1>
    %14 = arith.andi %13, %7 : vector<1x256xi1>
    %15 = vector.broadcast %3 : i32 to vector<1x256xi32>
    %16 = arith.addi %5, %15 : vector<1x256xi32>
    %17 = arith.select %14, %16, %5 : vector<1x256xi1>, vector<1x256xi32>
    %cst = arith.constant 0.000000e+00 : f32
    %18 = vector.broadcast %cst : f32 to vector<4x1xf32>
    %19 = vector.extract_strided_slice %0 {offsets = [0, 0], sizes = [4, 255], strides = [1, 1]} : vector<4x256xf32> to vector<4x255xf32>
    %20 = tpu.concatenate %18, %19 in 1 : vector<4x1xf32>, vector<4x255xf32> -> vector<4x256xf32>
    %21 = vector.extract_strided_slice %0 {offsets = [0, 1], sizes = [4, 255], strides = [1, 1]} : vector<4x256xf32> to vector<4x255xf32>
    %22 = tpu.concatenate %21, %18 in 1 : vector<4x255xf32>, vector<4x1xf32> -> vector<4x256xf32>
    %c0_i32_4 = arith.constant 0 : i32
    %23 = vector.broadcast %c0_i32_4 : i32 to vector<1x256xi32>
    %24 = arith.cmpi eq, %17, %23 : vector<1x256xi32>
    %cst_5 = arith.constant 0.000000e+00 : f32
    %25 = vector.shape_cast %24 : vector<1x256xi1> to vector<1x256xi1>
    %26 = vector.broadcast %25 : vector<1x256xi1> to vector<4x256xi1>
    %27 = vector.broadcast %cst_5 : f32 to vector<4x256xf32>
    %28 = arith.select %26, %27, %20 : vector<4x256xi1>, vector<4x256xf32>
    %c127_i32 = arith.constant 127 : i32
    %29 = vector.broadcast %c127_i32 : i32 to vector<1x256xi32>
    %30 = arith.cmpi eq, %17, %29 : vector<1x256xi32>
    %cst_6 = arith.constant 0.000000e+00 : f32
    %31 = vector.shape_cast %30 : vector<1x256xi1> to vector<1x256xi1>
    %32 = vector.broadcast %31 : vector<1x256xi1> to vector<4x256xi1>
    %33 = vector.broadcast %cst_6 : f32 to vector<4x256xf32>
    %34 = arith.select %32, %33, %22 : vector<4x256xi1>, vector<4x256xf32>
    %35 = tpu.concatenate %28, %0, %34 in 0 : vector<4x256xf32>, vector<4x256xf32>, vector<4x256xf32> -> vector<12x256xf32>
    %c0_7 = arith.constant 0 : index
    %c0_8 = arith.constant 0 : index
    %36 = vector.load %arg2[%c0_7, %c0_8] : memref<8x12xf32, #tpu.memory_space<vmem>>, vector<8x12xf32>
    %cst_9 = arith.constant dense<0.000000e+00> : vector<8x256xf32>
    %37 = tpu.matmul %36, %35, %cst_9 {dimension_numbers = #tpu.dot_dimension_numbers<[1], [0], [0], [1], [0, 0, 1, 1], [], []>} : vector<8x12xf32>, vector<12x256xf32>, vector<8x256xf32> -> vector<8x256xf32>
    %cst_10 = arith.constant dense<0.000000e+00> : vector<8xf32>
    %38 = vector.multi_reduction <add>, %37, %cst_10 [1] : vector<8x256xf32> to vector<8xf32>
    %39 = vector.shape_cast %38 : vector<8xf32> to vector<8x1xf32>
    %cst_11 = arith.constant 2.560000e+02 : f32
    %40 = vector.broadcast %cst_11 : f32 to vector<8x1xf32>
    %41 = arith.divf %39, %40 : vector<8x1xf32>
    %42 = vector.broadcast %41 : vector<8x1xf32> to vector<8x256xf32>
    %43 = arith.subf %37, %42 : vector<8x256xf32>
    %44 = arith.mulf %43, %43 : vector<8x256xf32>
    %cst_12 = arith.constant dense<0.000000e+00> : vector<8xf32>
    %45 = vector.multi_reduction <add>, %44, %cst_12 [1] : vector<8x256xf32> to vector<8xf32>
    %46 = vector.shape_cast %45 : vector<8xf32> to vector<8x1xf32>
    %cst_13 = arith.constant 2.560000e+02 : f32
    %47 = vector.broadcast %cst_13 : f32 to vector<8x1xf32>
    %48 = arith.divf %46, %47 : vector<8x1xf32>
    %cst_14 = arith.constant 9.99999974E-6 : f32
    %49 = vector.broadcast %cst_14 : f32 to vector<8x1xf32>
    %50 = arith.addf %48, %49 : vector<8x1xf32>
    %51 = math.rsqrt %50 : vector<8x1xf32>
    %52 = vector.broadcast %51 : vector<8x1xf32> to vector<8x256xf32>
    %53 = arith.mulf %43, %52 : vector<8x256xf32>
    %c0_15 = arith.constant 0 : index
    %c0_16 = arith.constant 0 : index
    %54 = vector.load %arg3[%c0_15, %c0_16] : memref<8x1xf32, #tpu.memory_space<vmem>>, vector<8x1xf32>
    %55 = vector.broadcast %54 : vector<8x1xf32> to vector<8x256xf32>
    %56 = arith.mulf %53, %55 : vector<8x256xf32>
    %c0_17 = arith.constant 0 : index
    %c0_18 = arith.constant 0 : index
    %57 = vector.load %arg4[%c0_17, %c0_18] : memref<8x1xf32, #tpu.memory_space<vmem>>, vector<8x1xf32>
    %58 = vector.broadcast %57 : vector<8x1xf32> to vector<8x256xf32>
    %59 = arith.addf %56, %58 : vector<8x256xf32>
    %c0_19 = arith.constant 0 : index
    %c0_20 = arith.constant 0 : index
    %60 = vector.load %arg5[%c0_19, %c0_20] : memref<8x256xf32, #tpu.memory_space<vmem>>, vector<8x256xf32>
    tpu.vector_store %arg5[%c0_19, %c0_20], %59 {strides = array<i32>} : memref<8x256xf32, #tpu.memory_space<vmem>>, vector<8x256xf32>,
    return
  }
  func.func @transform_0(%arg0: i32) -> (i32, i32) {
    %c0_i32 = arith.constant 0 : i32
    %c0_i32_0 = arith.constant 0 : i32
    %c0_i32_1 = arith.constant 0 : i32
    return %c0_i32, %c0_i32_0 : i32, i32
  }
  func.func @transform_1(%arg0: i32) -> (i32, i32) {
    %c0_i32 = arith.constant 0 : i32
    %c0_i32_0 = arith.constant 0 : i32
    return %arg0, %c0_i32 : i32, i32
  }
  func.func @transform_2(%arg0: i32) -> (i32, i32) {
    %c0_i32 = arith.constant 0 : i32
    %c0_i32_0 = arith.constant 0 : i32
    return %arg0, %c0_i32 : i32, i32
  }
  func.func @transform_3(%arg0: i32) -> (i32, i32) {
    %c0_i32 = arith.constant 0 : i32
    %c0_i32_0 = arith.constant 0 : i32
    return %arg0, %c0_i32 : i32, i32
  }
  func.func @transform_4(%arg0: i32) -> (i32, i32) {
    %c0_i32 = arith.constant 0 : i32
    %c0_i32_0 = arith.constant 0 : i32
    return %arg0, %c0_i32 : i32, i32
  }
}

module attributes {stable_mosaic.version = 11 : i64} {
  func.func @_shrink_thr_kernel(%arg0: memref<8x256xf32, #tpu.memory_space<vmem>>, %arg1: memref<8x8xf32, #tpu.memory_space<vmem>>, %arg2: memref<8x1xf32, #tpu.memory_space<vmem>>, %arg3: memref<8x1xf32, #tpu.memory_space<vmem>>, %arg4: memref<8x1xf32, #tpu.memory_space<vmem>>, %arg5: memref<8x8xf32, #tpu.memory_space<vmem>>, %arg6: memref<8x1xf32, #tpu.memory_space<vmem>>, %arg7: memref<8x8xf32, #tpu.memory_space<vmem>>, %arg8: memref<8x8xf32, #tpu.memory_space<vmem>>, %arg9: memref<8x1xf32, #tpu.memory_space<vmem>>, %arg10: memref<8x2xf32, #tpu.memory_space<vmem>>) attributes {dimension_semantics = [], scalar_prefetch = 0 : i64, scratch_operands = 0 : i64, tpu.core_type = #tpu.core_type<tc>} {
    %c0 = arith.constant 0 : index
    %c0_0 = arith.constant 0 : index
    %0 = vector.load %arg0[%c0, %c0_0] : memref<8x256xf32, #tpu.memory_space<vmem>>, vector<8x256xf32>
    %1 = vector.extract_strided_slice %0 {offsets = [0, 0], sizes = [8, 128], strides = [1, 1]} : vector<8x256xf32> to vector<8x128xf32>
    %cst = arith.constant dense<0.000000e+00> : vector<8xf32>
    %2 = vector.multi_reduction <add>, %1, %cst [1] : vector<8x128xf32> to vector<8xf32>
    %3 = vector.shape_cast %2 : vector<8xf32> to vector<8x1xf32>
    %cst_1 = arith.constant 1.280000e+02 : f32
    %4 = vector.broadcast %cst_1 : f32 to vector<8x1xf32>
    %5 = arith.divf %3, %4 : vector<8x1xf32>
    %6 = vector.extract_strided_slice %1 {offsets = [0, 0], sizes = [8, 64], strides = [1, 1]} : vector<8x128xf32> to vector<8x64xf32>
    %cst_2 = arith.constant dense<0xFF800000> : vector<8xf32>
    %7 = vector.multi_reduction <maximumf>, %6, %cst_2 [1] : vector<8x64xf32> to vector<8xf32>
    %8 = vector.shape_cast %7 : vector<8xf32> to vector<8x1xf32>
    %9 = vector.extract_strided_slice %1 {offsets = [0, 64], sizes = [8, 64], strides = [1, 1]} : vector<8x128xf32> to vector<8x64xf32>
    %cst_3 = arith.constant dense<0xFF800000> : vector<8xf32>
    %10 = vector.multi_reduction <maximumf>, %9, %cst_3 [1] : vector<8x64xf32> to vector<8xf32>
    %11 = vector.shape_cast %10 : vector<8xf32> to vector<8x1xf32>
    %12 = arith.addf %8, %11 : vector<8x1xf32>
    %cst_4 = arith.constant 5.000000e-01 : f32
    %13 = vector.broadcast %cst_4 : f32 to vector<8x1xf32>
    %14 = arith.mulf %12, %13 : vector<8x1xf32>
    %15 = vector.extract_strided_slice %0 {offsets = [0, 128], sizes = [8, 128], strides = [1, 1]} : vector<8x256xf32> to vector<8x128xf32>
    %cst_5 = arith.constant dense<0.000000e+00> : vector<8xf32>
    %16 = vector.multi_reduction <add>, %15, %cst_5 [1] : vector<8x128xf32> to vector<8xf32>
    %17 = vector.shape_cast %16 : vector<8xf32> to vector<8x1xf32>
    %cst_6 = arith.constant 1.280000e+02 : f32
    %18 = vector.broadcast %cst_6 : f32 to vector<8x1xf32>
    %19 = arith.divf %17, %18 : vector<8x1xf32>
    %20 = vector.extract_strided_slice %15 {offsets = [0, 0], sizes = [8, 64], strides = [1, 1]} : vector<8x128xf32> to vector<8x64xf32>
    %cst_7 = arith.constant dense<0xFF800000> : vector<8xf32>
    %21 = vector.multi_reduction <maximumf>, %20, %cst_7 [1] : vector<8x64xf32> to vector<8xf32>
    %22 = vector.shape_cast %21 : vector<8xf32> to vector<8x1xf32>
    %23 = vector.extract_strided_slice %15 {offsets = [0, 64], sizes = [8, 64], strides = [1, 1]} : vector<8x128xf32> to vector<8x64xf32>
    %cst_8 = arith.constant dense<0xFF800000> : vector<8xf32>
    %24 = vector.multi_reduction <maximumf>, %23, %cst_8 [1] : vector<8x64xf32> to vector<8xf32>
    %25 = vector.shape_cast %24 : vector<8xf32> to vector<8x1xf32>
    %26 = arith.addf %22, %25 : vector<8x1xf32>
    %cst_9 = arith.constant 5.000000e-01 : f32
    %27 = vector.broadcast %cst_9 : f32 to vector<8x1xf32>
    %28 = arith.mulf %26, %27 : vector<8x1xf32>
    %29 = tpu.concatenate %5, %19 in 1 : vector<8x1xf32>, vector<8x1xf32> -> vector<8x2xf32>
    %30 = tpu.concatenate %14, %28 in 1 : vector<8x1xf32>, vector<8x1xf32> -> vector<8x2xf32>
    %c0_10 = arith.constant 0 : index
    %c0_11 = arith.constant 0 : index
    %31 = vector.load %arg1[%c0_10, %c0_11] : memref<8x8xf32, #tpu.memory_space<vmem>>, vector<8x8xf32>
    %c0_12 = arith.constant 0 : index
    %c0_13 = arith.constant 0 : index
    %32 = vector.load %arg2[%c0_12, %c0_13] : memref<8x1xf32, #tpu.memory_space<vmem>>, vector<8x1xf32>
    %c0_14 = arith.constant 0 : index
    %c0_15 = arith.constant 0 : index
    %33 = vector.load %arg3[%c0_14, %c0_15] : memref<8x1xf32, #tpu.memory_space<vmem>>, vector<8x1xf32>
    %c0_16 = arith.constant 0 : index
    %c0_17 = arith.constant 0 : index
    %34 = vector.load %arg4[%c0_16, %c0_17] : memref<8x1xf32, #tpu.memory_space<vmem>>, vector<8x1xf32>
    %c0_18 = arith.constant 0 : index
    %c0_19 = arith.constant 0 : index
    %35 = vector.load %arg5[%c0_18, %c0_19] : memref<8x8xf32, #tpu.memory_space<vmem>>, vector<8x8xf32>
    %c0_20 = arith.constant 0 : index
    %c0_21 = arith.constant 0 : index
    %36 = vector.load %arg6[%c0_20, %c0_21] : memref<8x1xf32, #tpu.memory_space<vmem>>, vector<8x1xf32>
    %cst_22 = arith.constant dense<0.000000e+00> : vector<8x2xf32>
    %37 = tpu.matmul %31, %29, %cst_22 {dimension_numbers = #tpu.dot_dimension_numbers<[1], [0], [0], [1], [0, 0, 1, 1], [], []>} : vector<8x8xf32>, vector<8x2xf32>, vector<8x2xf32> -> vector<8x2xf32>
    %38 = vector.broadcast %32 : vector<8x1xf32> to vector<8x2xf32>
    %39 = arith.addf %37, %38 : vector<8x2xf32>
    %cst_23 = arith.constant dense<0.000000e+00> : vector<8xf32>
    %40 = vector.multi_reduction <add>, %39, %cst_23 [1] : vector<8x2xf32> to vector<8xf32>
    %41 = vector.shape_cast %40 : vector<8xf32> to vector<8x1xf32>
    %cst_24 = arith.constant 2.000000e+00 : f32
    %42 = vector.broadcast %cst_24 : f32 to vector<8x1xf32>
    %43 = arith.divf %41, %42 : vector<8x1xf32>
    %44 = vector.broadcast %43 : vector<8x1xf32> to vector<8x2xf32>
    %45 = arith.subf %39, %44 : vector<8x2xf32>
    %46 = arith.mulf %45, %45 : vector<8x2xf32>
    %cst_25 = arith.constant dense<0.000000e+00> : vector<8xf32>
    %47 = vector.multi_reduction <add>, %46, %cst_25 [1] : vector<8x2xf32> to vector<8xf32>
    %48 = vector.shape_cast %47 : vector<8xf32> to vector<8x1xf32>
    %cst_26 = arith.constant 2.000000e+00 : f32
    %49 = vector.broadcast %cst_26 : f32 to vector<8x1xf32>
    %50 = arith.divf %48, %49 : vector<8x1xf32>
    %cst_27 = arith.constant 9.99999974E-6 : f32
    %51 = vector.broadcast %cst_27 : f32 to vector<8x1xf32>
    %52 = arith.addf %50, %51 : vector<8x1xf32>
    %53 = math.rsqrt %52 : vector<8x1xf32>
    %54 = vector.broadcast %53 : vector<8x1xf32> to vector<8x2xf32>
    %55 = arith.mulf %45, %54 : vector<8x2xf32>
    %56 = vector.broadcast %33 : vector<8x1xf32> to vector<8x2xf32>
    %57 = arith.mulf %55, %56 : vector<8x2xf32>
    %58 = vector.broadcast %34 : vector<8x1xf32> to vector<8x2xf32>
    %59 = arith.addf %57, %58 : vector<8x2xf32>
    %cst_28 = arith.constant 0.000000e+00 : f32
    %60 = vector.broadcast %cst_28 : f32 to vector<8x2xf32>
    %61 = arith.maximumf %59, %60 : vector<8x2xf32>
    %cst_29 = arith.constant dense<0.000000e+00> : vector<8x2xf32>
    %62 = tpu.matmul %35, %61, %cst_29 {dimension_numbers = #tpu.dot_dimension_numbers<[1], [0], [0], [1], [0, 0, 1, 1], [], []>} : vector<8x8xf32>, vector<8x2xf32>, vector<8x2xf32> -> vector<8x2xf32>
    %63 = vector.broadcast %36 : vector<8x1xf32> to vector<8x2xf32>
    %64 = arith.addf %62, %63 : vector<8x2xf32>
    %65 = arith.negf %64 : vector<8x2xf32>
    %66 = math.exp %65 : vector<8x2xf32>
    %cst_30 = arith.constant 1.000000e+00 : f32
    %67 = vector.broadcast %cst_30 : f32 to vector<8x2xf32>
    %68 = arith.addf %67, %66 : vector<8x2xf32>
    %69 = arith.divf %67, %68 : vector<8x2xf32>
    %70 = arith.mulf %29, %69 : vector<8x2xf32>
    %cst_31 = arith.constant dense<0.000000e+00> : vector<8x2xf32>
    %71 = tpu.matmul %31, %30, %cst_31 {dimension_numbers = #tpu.dot_dimension_numbers<[1], [0], [0], [1], [0, 0, 1, 1], [], []>} : vector<8x8xf32>, vector<8x2xf32>, vector<8x2xf32> -> vector<8x2xf32>
    %72 = vector.broadcast %32 : vector<8x1xf32> to vector<8x2xf32>
    %73 = arith.addf %71, %72 : vector<8x2xf32>
    %cst_32 = arith.constant dense<0.000000e+00> : vector<8xf32>
    %74 = vector.multi_reduction <add>, %73, %cst_32 [1] : vector<8x2xf32> to vector<8xf32>
    %75 = vector.shape_cast %74 : vector<8xf32> to vector<8x1xf32>
    %cst_33 = arith.constant 2.000000e+00 : f32
    %76 = vector.broadcast %cst_33 : f32 to vector<8x1xf32>
    %77 = arith.divf %75, %76 : vector<8x1xf32>
    %78 = vector.broadcast %77 : vector<8x1xf32> to vector<8x2xf32>
    %79 = arith.subf %73, %78 : vector<8x2xf32>
    %80 = arith.mulf %79, %79 : vector<8x2xf32>
    %cst_34 = arith.constant dense<0.000000e+00> : vector<8xf32>
    %81 = vector.multi_reduction <add>, %80, %cst_34 [1] : vector<8x2xf32> to vector<8xf32>
    %82 = vector.shape_cast %81 : vector<8xf32> to vector<8x1xf32>
    %cst_35 = arith.constant 2.000000e+00 : f32
    %83 = vector.broadcast %cst_35 : f32 to vector<8x1xf32>
    %84 = arith.divf %82, %83 : vector<8x1xf32>
    %cst_36 = arith.constant 9.99999974E-6 : f32
    %85 = vector.broadcast %cst_36 : f32 to vector<8x1xf32>
    %86 = arith.addf %84, %85 : vector<8x1xf32>
    %87 = math.rsqrt %86 : vector<8x1xf32>
    %88 = vector.broadcast %87 : vector<8x1xf32> to vector<8x2xf32>
    %89 = arith.mulf %79, %88 : vector<8x2xf32>
    %90 = vector.broadcast %33 : vector<8x1xf32> to vector<8x2xf32>
    %91 = arith.mulf %89, %90 : vector<8x2xf32>
    %92 = vector.broadcast %34 : vector<8x1xf32> to vector<8x2xf32>
    %93 = arith.addf %91, %92 : vector<8x2xf32>
    %cst_37 = arith.constant 0.000000e+00 : f32
    %94 = vector.broadcast %cst_37 : f32 to vector<8x2xf32>
    %95 = arith.maximumf %93, %94 : vector<8x2xf32>
    %cst_38 = arith.constant dense<0.000000e+00> : vector<8x2xf32>
    %96 = tpu.matmul %35, %95, %cst_38 {dimension_numbers = #tpu.dot_dimension_numbers<[1], [0], [0], [1], [0, 0, 1, 1], [], []>} : vector<8x8xf32>, vector<8x2xf32>, vector<8x2xf32> -> vector<8x2xf32>
    %97 = vector.broadcast %36 : vector<8x1xf32> to vector<8x2xf32>
    %98 = arith.addf %96, %97 : vector<8x2xf32>
    %99 = arith.negf %98 : vector<8x2xf32>
    %100 = math.exp %99 : vector<8x2xf32>
    %cst_39 = arith.constant 1.000000e+00 : f32
    %101 = vector.broadcast %cst_39 : f32 to vector<8x2xf32>
    %102 = arith.addf %101, %100 : vector<8x2xf32>
    %103 = arith.divf %101, %102 : vector<8x2xf32>
    %104 = arith.mulf %30, %103 : vector<8x2xf32>
    %c0_40 = arith.constant 0 : index
    %c0_41 = arith.constant 0 : index
    %105 = vector.load %arg7[%c0_40, %c0_41] : memref<8x8xf32, #tpu.memory_space<vmem>>, vector<8x8xf32>
    %cst_42 = arith.constant dense<0.000000e+00> : vector<8x2xf32>
    %106 = tpu.matmul %105, %70, %cst_42 {dimension_numbers = #tpu.dot_dimension_numbers<[1], [0], [0], [1], [0, 0, 1, 1], [], []>} : vector<8x8xf32>, vector<8x2xf32>, vector<8x2xf32> -> vector<8x2xf32>
    %c0_43 = arith.constant 0 : index
    %c0_44 = arith.constant 0 : index
    %107 = vector.load %arg8[%c0_43, %c0_44] : memref<8x8xf32, #tpu.memory_space<vmem>>, vector<8x8xf32>
    %cst_45 = arith.constant dense<0.000000e+00> : vector<8x2xf32>
    %108 = tpu.matmul %107, %104, %cst_45 {dimension_numbers = #tpu.dot_dimension_numbers<[1], [0], [0], [1], [0, 0, 1, 1], [], []>} : vector<8x8xf32>, vector<8x2xf32>, vector<8x2xf32> -> vector<8x2xf32>
    %109 = arith.addf %106, %108 : vector<8x2xf32>
    %c0_46 = arith.constant 0 : index
    %c0_47 = arith.constant 0 : index
    %110 = vector.load %arg9[%c0_46, %c0_47] : memref<8x1xf32, #tpu.memory_space<vmem>>, vector<8x1xf32>
    %111 = vector.broadcast %110 : vector<8x1xf32> to vector<8x2xf32>
    %112 = arith.addf %109, %111 : vector<8x2xf32>
    %c0_48 = arith.constant 0 : index
    %c0_49 = arith.constant 0 : index
    %113 = vector.load %arg10[%c0_48, %c0_49] : memref<8x2xf32, #tpu.memory_space<vmem>>, vector<8x2xf32>
    tpu.vector_store %arg10[%c0_48, %c0_49], %112 {strides = array<i32>} : memref<8x2xf32, #tpu.memory_space<vmem>>, vector<8x2xf32>,
    return
  }
}

module attributes {stable_mosaic.version = 11 : i64} {
  func.func @_shrink_apply_tiled_kernel(%arg0: i32, %arg1: i32, %arg2: memref<8x128xf32, #tpu.memory_space<vmem>>, %arg3: memref<8x128xf32, #tpu.memory_space<vmem>>, %arg4: memref<8x2xf32, #tpu.memory_space<vmem>>, %arg5: memref<8x128xf32, #tpu.memory_space<vmem>>) attributes {dimension_semantics = [#tpu.dimension_semantics<parallel>, #tpu.dimension_semantics<parallel>], iteration_bounds = array<i64: 2, 1>, scalar_prefetch = 0 : i64, scratch_operands = 0 : i64, tpu.core_type = #tpu.core_type<tc>, window_params = [{transform_indices = @transform_0, window_bounds = array<i64: 8, 128>}, {transform_indices = @transform_1, window_bounds = array<i64: 8, 128>}, {pipeline_mode = #tpu.pipeline_mode<synchronous>, transform_indices = @transform_2, window_bounds = array<i64: 8, 2>}, {transform_indices = @transform_3, window_bounds = array<i64: 8, 128>}]} {
    %c0 = arith.constant 0 : index
    %c0_0 = arith.constant 0 : index
    %0 = vector.load %arg4[%c0, %c0_0] : memref<8x2xf32, #tpu.memory_space<vmem>>, vector<8x2xf32>
    %1 = tpu.iota {dimensions = array<i32: 1>} : vector<8x2xi32>
    %2 = vector.broadcast %arg0 : i32 to vector<8x2xi32>
    %3 = arith.cmpi eq, %1, %2 : vector<8x2xi32>
    %cst = arith.constant 0.000000e+00 : f32
    %4 = vector.broadcast %cst : f32 to vector<8x2xf32>
    %5 = arith.select %3, %0, %4 : vector<8x2xi1>, vector<8x2xf32>
    %cst_1 = arith.constant dense<0.000000e+00> : vector<8xf32>
    %6 = vector.multi_reduction <add>, %5, %cst_1 [1] : vector<8x2xf32> to vector<8xf32>
    %7 = vector.shape_cast %6 : vector<8xf32> to vector<8x1xf32>
    %c0_2 = arith.constant 0 : index
    %c0_3 = arith.constant 0 : index
    %8 = vector.load %arg2[%c0_2, %c0_3] : memref<8x128xf32, #tpu.memory_space<vmem>>, vector<8x128xf32>
    %c0_4 = arith.constant 0 : index
    %c0_5 = arith.constant 0 : index
    %9 = vector.load %arg3[%c0_4, %c0_5] : memref<8x128xf32, #tpu.memory_space<vmem>>, vector<8x128xf32>
    %10 = math.absf %8 : vector<8x128xf32>
    %11 = vector.broadcast %7 : vector<8x1xf32> to vector<8x128xf32>
    %12 = arith.subf %10, %11 : vector<8x128xf32>
    %cst_6 = arith.constant 0.000000e+00 : f32
    %13 = vector.broadcast %cst_6 : f32 to vector<8x128xf32>
    %14 = arith.maximumf %12, %13 : vector<8x128xf32>
    %cst_7 = arith.constant 0.000000e+00 : f32
    %15 = vector.broadcast %cst_7 : f32 to vector<8x128xf32>
    %16 = arith.cmpf ogt, %8, %15 : vector<8x128xf32>
    %cst_8 = arith.constant 0.000000e+00 : f32
    %17 = vector.broadcast %cst_8 : f32 to vector<8x128xf32>
    %18 = arith.cmpf olt, %8, %17 : vector<8x128xf32>
    %cst_9 = arith.constant -1.000000e+00 : f32
    %cst_10 = arith.constant 0.000000e+00 : f32
    %19 = vector.broadcast %cst_9 : f32 to vector<8x128xf32>
    %20 = vector.broadcast %cst_10 : f32 to vector<8x128xf32>
    %21 = arith.select %18, %19, %20 : vector<8x128xi1>, vector<8x128xf32>
    %cst_11 = arith.constant 1.000000e+00 : f32
    %22 = vector.broadcast %cst_11 : f32 to vector<8x128xf32>
    %23 = arith.select %16, %22, %21 : vector<8x128xi1>, vector<8x128xf32>
    %24 = arith.mulf %23, %14 : vector<8x128xf32>
    %25 = arith.addf %24, %9 : vector<8x128xf32>
    %c0_12 = arith.constant 0 : index
    %c0_13 = arith.constant 0 : index
    %26 = vector.load %arg5[%c0_12, %c0_13] : memref<8x128xf32, #tpu.memory_space<vmem>>, vector<8x128xf32>
    tpu.vector_store %arg5[%c0_12, %c0_13], %25 {strides = array<i32>} : memref<8x128xf32, #tpu.memory_space<vmem>>, vector<8x128xf32>,
    return
  }
  func.func @transform_0(%arg0: i32, %arg1: i32) -> (i32, i32) {
    %c1_i32 = arith.constant 1 : i32
    %0 = arith.muli %arg0, %c1_i32 : i32
    %1 = arith.addi %0, %arg1 : i32
    %c0_i32 = arith.constant 0 : i32
    %c0_i32_0 = arith.constant 0 : i32
    return %c0_i32, %1 : i32, i32
  }
  func.func @transform_1(%arg0: i32, %arg1: i32) -> (i32, i32) {
    %c1_i32 = arith.constant 1 : i32
    %0 = arith.muli %arg0, %c1_i32 : i32
    %1 = arith.addi %0, %arg1 : i32
    %c0_i32 = arith.constant 0 : i32
    %c0_i32_0 = arith.constant 0 : i32
    return %c0_i32, %1 : i32, i32
  }
  func.func @transform_2(%arg0: i32, %arg1: i32) -> (i32, i32) {
    %c0_i32 = arith.constant 0 : i32
    %c0_i32_0 = arith.constant 0 : i32
    %c0_i32_1 = arith.constant 0 : i32
    return %c0_i32, %c0_i32_0 : i32, i32
  }
  func.func @transform_3(%arg0: i32, %arg1: i32) -> (i32, i32) {
    %c1_i32 = arith.constant 1 : i32
    %0 = arith.muli %arg0, %c1_i32 : i32
    %1 = arith.addi %0, %arg1 : i32
    %c0_i32 = arith.constant 0 : i32
    %c0_i32_0 = arith.constant 0 : i32
    return %c0_i32, %1 : i32, i32
  }
}

module attributes {stable_mosaic.version = 11 : i64} {
  func.func @_conv_bn_kernel(%arg0: i32, %arg1: memref<8x256xf32, #tpu.memory_space<vmem>>, %arg2: memref<8x24xf32, #tpu.memory_space<vmem>>, %arg3: memref<8x1xf32, #tpu.memory_space<vmem>>, %arg4: memref<8x1xf32, #tpu.memory_space<vmem>>, %arg5: memref<8x256xf32, #tpu.memory_space<vmem>>) attributes {dimension_semantics = [#tpu.dimension_semantics<parallel>], iteration_bounds = array<i64: 1>, scalar_prefetch = 0 : i64, scratch_operands = 0 : i64, tpu.core_type = #tpu.core_type<tc>, window_params = [{pipeline_mode = #tpu.pipeline_mode<synchronous>, transform_indices = @transform_0, window_bounds = array<i64: 8, 256>}, {transform_indices = @transform_1, window_bounds = array<i64: 8, 24>}, {transform_indices = @transform_2, window_bounds = array<i64: 8, 1>}, {transform_indices = @transform_3, window_bounds = array<i64: 8, 1>}, {transform_indices = @transform_4, window_bounds = array<i64: 8, 256>}]} {
    %c0 = arith.constant 0 : index
    %c0_0 = arith.constant 0 : index
    %0 = vector.load %arg1[%c0, %c0_0] : memref<8x256xf32, #tpu.memory_space<vmem>>, vector<8x256xf32>
    %1 = tpu.iota {dimensions = array<i32: 1>} : vector<1x256xi32>
    %c128_i32 = arith.constant 128 : i32
    %c0_i32 = arith.constant 0 : i32
    %2 = arith.cmpi eq, %c128_i32, %c0_i32 : i32
    %c1_i32 = arith.constant 1 : i32
    %3 = arith.select %2, %c1_i32, %c128_i32 : i32
    %4 = vector.broadcast %3 : i32 to vector<1x256xi32>
    %5 = arith.remsi %1, %4 : vector<1x256xi32>
    %c0_i32_1 = arith.constant 0 : i32
    %6 = vector.broadcast %c0_i32_1 : i32 to vector<1x256xi32>
    %7 = arith.cmpi ne, %5, %6 : vector<1x256xi32>
    %c0_i32_2 = arith.constant 0 : i32
    %8 = vector.broadcast %c0_i32_2 : i32 to vector<1x256xi32>
    %9 = arith.cmpi slt, %5, %8 : vector<1x256xi32>
    %c0_i32_3 = arith.constant 0 : i32
    %10 = arith.cmpi slt, %3, %c0_i32_3 : i32
    %11 = vector.broadcast %10 : i1 to vector<1x256xi1>
    %12 = vector.broadcast %11 : vector<1x256xi1> to vector<1x256xi1>
    %13 = arith.xori %9, %12 : vector<1x256xi1>
    %14 = arith.andi %13, %7 : vector<1x256xi1>
    %15 = vector.broadcast %3 : i32 to vector<1x256xi32>
    %16 = arith.addi %5, %15 : vector<1x256xi32>
    %17 = arith.select %14, %16, %5 : vector<1x256xi1>, vector<1x256xi32>
    %cst = arith.constant 0.000000e+00 : f32
    %18 = vector.broadcast %cst : f32 to vector<8x1xf32>
    %19 = vector.extract_strided_slice %0 {offsets = [0, 0], sizes = [8, 255], strides = [1, 1]} : vector<8x256xf32> to vector<8x255xf32>
    %20 = tpu.concatenate %18, %19 in 1 : vector<8x1xf32>, vector<8x255xf32> -> vector<8x256xf32>
    %21 = vector.extract_strided_slice %0 {offsets = [0, 1], sizes = [8, 255], strides = [1, 1]} : vector<8x256xf32> to vector<8x255xf32>
    %22 = tpu.concatenate %21, %18 in 1 : vector<8x255xf32>, vector<8x1xf32> -> vector<8x256xf32>
    %c0_i32_4 = arith.constant 0 : i32
    %23 = vector.broadcast %c0_i32_4 : i32 to vector<1x256xi32>
    %24 = arith.cmpi eq, %17, %23 : vector<1x256xi32>
    %cst_5 = arith.constant 0.000000e+00 : f32
    %25 = vector.shape_cast %24 : vector<1x256xi1> to vector<1x256xi1>
    %26 = vector.broadcast %25 : vector<1x256xi1> to vector<8x256xi1>
    %27 = vector.broadcast %cst_5 : f32 to vector<8x256xf32>
    %28 = arith.select %26, %27, %20 : vector<8x256xi1>, vector<8x256xf32>
    %c127_i32 = arith.constant 127 : i32
    %29 = vector.broadcast %c127_i32 : i32 to vector<1x256xi32>
    %30 = arith.cmpi eq, %17, %29 : vector<1x256xi32>
    %cst_6 = arith.constant 0.000000e+00 : f32
    %31 = vector.shape_cast %30 : vector<1x256xi1> to vector<1x256xi1>
    %32 = vector.broadcast %31 : vector<1x256xi1> to vector<8x256xi1>
    %33 = vector.broadcast %cst_6 : f32 to vector<8x256xf32>
    %34 = arith.select %32, %33, %22 : vector<8x256xi1>, vector<8x256xf32>
    %35 = tpu.concatenate %28, %0, %34 in 0 : vector<8x256xf32>, vector<8x256xf32>, vector<8x256xf32> -> vector<24x256xf32>
    %c0_7 = arith.constant 0 : index
    %c0_8 = arith.constant 0 : index
    %36 = vector.load %arg2[%c0_7, %c0_8] : memref<8x24xf32, #tpu.memory_space<vmem>>, vector<8x24xf32>
    %cst_9 = arith.constant dense<0.000000e+00> : vector<8x256xf32>
    %37 = tpu.matmul %36, %35, %cst_9 {dimension_numbers = #tpu.dot_dimension_numbers<[1], [0], [0], [1], [0, 0, 1, 1], [], []>} : vector<8x24xf32>, vector<24x256xf32>, vector<8x256xf32> -> vector<8x256xf32>
    %cst_10 = arith.constant dense<0.000000e+00> : vector<8xf32>
    %38 = vector.multi_reduction <add>, %37, %cst_10 [1] : vector<8x256xf32> to vector<8xf32>
    %39 = vector.shape_cast %38 : vector<8xf32> to vector<8x1xf32>
    %cst_11 = arith.constant 2.560000e+02 : f32
    %40 = vector.broadcast %cst_11 : f32 to vector<8x1xf32>
    %41 = arith.divf %39, %40 : vector<8x1xf32>
    %42 = vector.broadcast %41 : vector<8x1xf32> to vector<8x256xf32>
    %43 = arith.subf %37, %42 : vector<8x256xf32>
    %44 = arith.mulf %43, %43 : vector<8x256xf32>
    %cst_12 = arith.constant dense<0.000000e+00> : vector<8xf32>
    %45 = vector.multi_reduction <add>, %44, %cst_12 [1] : vector<8x256xf32> to vector<8xf32>
    %46 = vector.shape_cast %45 : vector<8xf32> to vector<8x1xf32>
    %cst_13 = arith.constant 2.560000e+02 : f32
    %47 = vector.broadcast %cst_13 : f32 to vector<8x1xf32>
    %48 = arith.divf %46, %47 : vector<8x1xf32>
    %cst_14 = arith.constant 9.99999974E-6 : f32
    %49 = vector.broadcast %cst_14 : f32 to vector<8x1xf32>
    %50 = arith.addf %48, %49 : vector<8x1xf32>
    %51 = math.rsqrt %50 : vector<8x1xf32>
    %52 = vector.broadcast %51 : vector<8x1xf32> to vector<8x256xf32>
    %53 = arith.mulf %43, %52 : vector<8x256xf32>
    %c0_15 = arith.constant 0 : index
    %c0_16 = arith.constant 0 : index
    %54 = vector.load %arg3[%c0_15, %c0_16] : memref<8x1xf32, #tpu.memory_space<vmem>>, vector<8x1xf32>
    %55 = vector.broadcast %54 : vector<8x1xf32> to vector<8x256xf32>
    %56 = arith.mulf %53, %55 : vector<8x256xf32>
    %c0_17 = arith.constant 0 : index
    %c0_18 = arith.constant 0 : index
    %57 = vector.load %arg4[%c0_17, %c0_18] : memref<8x1xf32, #tpu.memory_space<vmem>>, vector<8x1xf32>
    %58 = vector.broadcast %57 : vector<8x1xf32> to vector<8x256xf32>
    %59 = arith.addf %56, %58 : vector<8x256xf32>
    %cst_19 = arith.constant 0.000000e+00 : f32
    %60 = vector.broadcast %cst_19 : f32 to vector<8x256xf32>
    %61 = arith.maximumf %59, %60 : vector<8x256xf32>
    %c0_20 = arith.constant 0 : index
    %c0_21 = arith.constant 0 : index
    %62 = vector.load %arg5[%c0_20, %c0_21] : memref<8x256xf32, #tpu.memory_space<vmem>>, vector<8x256xf32>
    tpu.vector_store %arg5[%c0_20, %c0_21], %61 {strides = array<i32>} : memref<8x256xf32, #tpu.memory_space<vmem>>, vector<8x256xf32>,
    return
  }
  func.func @transform_0(%arg0: i32) -> (i32, i32) {
    %c0_i32 = arith.constant 0 : i32
    %c0_i32_0 = arith.constant 0 : i32
    %c0_i32_1 = arith.constant 0 : i32
    return %c0_i32, %c0_i32_0 : i32, i32
  }
  func.func @transform_1(%arg0: i32) -> (i32, i32) {
    %c0_i32 = arith.constant 0 : i32
    %c0_i32_0 = arith.constant 0 : i32
    return %arg0, %c0_i32 : i32, i32
  }
  func.func @transform_2(%arg0: i32) -> (i32, i32) {
    %c0_i32 = arith.constant 0 : i32
    %c0_i32_0 = arith.constant 0 : i32
    return %arg0, %c0_i32 : i32, i32
  }
  func.func @transform_3(%arg0: i32) -> (i32, i32) {
    %c0_i32 = arith.constant 0 : i32
    %c0_i32_0 = arith.constant 0 : i32
    return %arg0, %c0_i32 : i32, i32
  }
  func.func @transform_4(%arg0: i32) -> (i32, i32) {
    %c0_i32 = arith.constant 0 : i32
    %c0_i32_0 = arith.constant 0 : i32
    return %arg0, %c0_i32 : i32, i32
  }
}

module attributes {stable_mosaic.version = 11 : i64} {
  func.func @_conv_bn_kernel(%arg0: i32, %arg1: memref<8x256xf32, #tpu.memory_space<vmem>>, %arg2: memref<16x24xf32, #tpu.memory_space<vmem>>, %arg3: memref<16x1xf32, #tpu.memory_space<vmem>>, %arg4: memref<16x1xf32, #tpu.memory_space<vmem>>, %arg5: memref<16x256xf32, #tpu.memory_space<vmem>>) attributes {dimension_semantics = [#tpu.dimension_semantics<parallel>], iteration_bounds = array<i64: 1>, scalar_prefetch = 0 : i64, scratch_operands = 0 : i64, tpu.core_type = #tpu.core_type<tc>, window_params = [{pipeline_mode = #tpu.pipeline_mode<synchronous>, transform_indices = @transform_0, window_bounds = array<i64: 8, 256>}, {transform_indices = @transform_1, window_bounds = array<i64: 16, 24>}, {transform_indices = @transform_2, window_bounds = array<i64: 16, 1>}, {transform_indices = @transform_3, window_bounds = array<i64: 16, 1>}, {transform_indices = @transform_4, window_bounds = array<i64: 16, 256>}]} {
    %c0 = arith.constant 0 : index
    %c0_0 = arith.constant 0 : index
    %0 = vector.load %arg1[%c0, %c0_0] : memref<8x256xf32, #tpu.memory_space<vmem>>, vector<8x256xf32>
    %1 = tpu.iota {dimensions = array<i32: 1>} : vector<1x256xi32>
    %c128_i32 = arith.constant 128 : i32
    %c0_i32 = arith.constant 0 : i32
    %2 = arith.cmpi eq, %c128_i32, %c0_i32 : i32
    %c1_i32 = arith.constant 1 : i32
    %3 = arith.select %2, %c1_i32, %c128_i32 : i32
    %4 = vector.broadcast %3 : i32 to vector<1x256xi32>
    %5 = arith.remsi %1, %4 : vector<1x256xi32>
    %c0_i32_1 = arith.constant 0 : i32
    %6 = vector.broadcast %c0_i32_1 : i32 to vector<1x256xi32>
    %7 = arith.cmpi ne, %5, %6 : vector<1x256xi32>
    %c0_i32_2 = arith.constant 0 : i32
    %8 = vector.broadcast %c0_i32_2 : i32 to vector<1x256xi32>
    %9 = arith.cmpi slt, %5, %8 : vector<1x256xi32>
    %c0_i32_3 = arith.constant 0 : i32
    %10 = arith.cmpi slt, %3, %c0_i32_3 : i32
    %11 = vector.broadcast %10 : i1 to vector<1x256xi1>
    %12 = vector.broadcast %11 : vector<1x256xi1> to vector<1x256xi1>
    %13 = arith.xori %9, %12 : vector<1x256xi1>
    %14 = arith.andi %13, %7 : vector<1x256xi1>
    %15 = vector.broadcast %3 : i32 to vector<1x256xi32>
    %16 = arith.addi %5, %15 : vector<1x256xi32>
    %17 = arith.select %14, %16, %5 : vector<1x256xi1>, vector<1x256xi32>
    %cst = arith.constant 0.000000e+00 : f32
    %18 = vector.broadcast %cst : f32 to vector<8x1xf32>
    %19 = vector.extract_strided_slice %0 {offsets = [0, 0], sizes = [8, 255], strides = [1, 1]} : vector<8x256xf32> to vector<8x255xf32>
    %20 = tpu.concatenate %18, %19 in 1 : vector<8x1xf32>, vector<8x255xf32> -> vector<8x256xf32>
    %21 = vector.extract_strided_slice %0 {offsets = [0, 1], sizes = [8, 255], strides = [1, 1]} : vector<8x256xf32> to vector<8x255xf32>
    %22 = tpu.concatenate %21, %18 in 1 : vector<8x255xf32>, vector<8x1xf32> -> vector<8x256xf32>
    %c0_i32_4 = arith.constant 0 : i32
    %23 = vector.broadcast %c0_i32_4 : i32 to vector<1x256xi32>
    %24 = arith.cmpi eq, %17, %23 : vector<1x256xi32>
    %cst_5 = arith.constant 0.000000e+00 : f32
    %25 = vector.shape_cast %24 : vector<1x256xi1> to vector<1x256xi1>
    %26 = vector.broadcast %25 : vector<1x256xi1> to vector<8x256xi1>
    %27 = vector.broadcast %cst_5 : f32 to vector<8x256xf32>
    %28 = arith.select %26, %27, %20 : vector<8x256xi1>, vector<8x256xf32>
    %c127_i32 = arith.constant 127 : i32
    %29 = vector.broadcast %c127_i32 : i32 to vector<1x256xi32>
    %30 = arith.cmpi eq, %17, %29 : vector<1x256xi32>
    %cst_6 = arith.constant 0.000000e+00 : f32
    %31 = vector.shape_cast %30 : vector<1x256xi1> to vector<1x256xi1>
    %32 = vector.broadcast %31 : vector<1x256xi1> to vector<8x256xi1>
    %33 = vector.broadcast %cst_6 : f32 to vector<8x256xf32>
    %34 = arith.select %32, %33, %22 : vector<8x256xi1>, vector<8x256xf32>
    %35 = tpu.concatenate %28, %0, %34 in 0 : vector<8x256xf32>, vector<8x256xf32>, vector<8x256xf32> -> vector<24x256xf32>
    %c0_7 = arith.constant 0 : index
    %c0_8 = arith.constant 0 : index
    %36 = vector.load %arg2[%c0_7, %c0_8] : memref<16x24xf32, #tpu.memory_space<vmem>>, vector<16x24xf32>
    %cst_9 = arith.constant dense<0.000000e+00> : vector<16x256xf32>
    %37 = tpu.matmul %36, %35, %cst_9 {dimension_numbers = #tpu.dot_dimension_numbers<[1], [0], [0], [1], [0, 0, 1, 1], [], []>} : vector<16x24xf32>, vector<24x256xf32>, vector<16x256xf32> -> vector<16x256xf32>
    %cst_10 = arith.constant dense<0.000000e+00> : vector<16xf32>
    %38 = vector.multi_reduction <add>, %37, %cst_10 [1] : vector<16x256xf32> to vector<16xf32>
    %39 = vector.shape_cast %38 : vector<16xf32> to vector<16x1xf32>
    %cst_11 = arith.constant 2.560000e+02 : f32
    %40 = vector.broadcast %cst_11 : f32 to vector<16x1xf32>
    %41 = arith.divf %39, %40 : vector<16x1xf32>
    %42 = vector.broadcast %41 : vector<16x1xf32> to vector<16x256xf32>
    %43 = arith.subf %37, %42 : vector<16x256xf32>
    %44 = arith.mulf %43, %43 : vector<16x256xf32>
    %cst_12 = arith.constant dense<0.000000e+00> : vector<16xf32>
    %45 = vector.multi_reduction <add>, %44, %cst_12 [1] : vector<16x256xf32> to vector<16xf32>
    %46 = vector.shape_cast %45 : vector<16xf32> to vector<16x1xf32>
    %cst_13 = arith.constant 2.560000e+02 : f32
    %47 = vector.broadcast %cst_13 : f32 to vector<16x1xf32>
    %48 = arith.divf %46, %47 : vector<16x1xf32>
    %cst_14 = arith.constant 9.99999974E-6 : f32
    %49 = vector.broadcast %cst_14 : f32 to vector<16x1xf32>
    %50 = arith.addf %48, %49 : vector<16x1xf32>
    %51 = math.rsqrt %50 : vector<16x1xf32>
    %52 = vector.broadcast %51 : vector<16x1xf32> to vector<16x256xf32>
    %53 = arith.mulf %43, %52 : vector<16x256xf32>
    %c0_15 = arith.constant 0 : index
    %c0_16 = arith.constant 0 : index
    %54 = vector.load %arg3[%c0_15, %c0_16] : memref<16x1xf32, #tpu.memory_space<vmem>>, vector<16x1xf32>
    %55 = vector.broadcast %54 : vector<16x1xf32> to vector<16x256xf32>
    %56 = arith.mulf %53, %55 : vector<16x256xf32>
    %c0_17 = arith.constant 0 : index
    %c0_18 = arith.constant 0 : index
    %57 = vector.load %arg4[%c0_17, %c0_18] : memref<16x1xf32, #tpu.memory_space<vmem>>, vector<16x1xf32>
    %58 = vector.broadcast %57 : vector<16x1xf32> to vector<16x256xf32>
    %59 = arith.addf %56, %58 : vector<16x256xf32>
    %c0_19 = arith.constant 0 : index
    %c0_20 = arith.constant 0 : index
    %60 = vector.load %arg5[%c0_19, %c0_20] : memref<16x256xf32, #tpu.memory_space<vmem>>, vector<16x256xf32>
    tpu.vector_store %arg5[%c0_19, %c0_20], %59 {strides = array<i32>} : memref<16x256xf32, #tpu.memory_space<vmem>>, vector<16x256xf32>,
    return
  }
  func.func @transform_0(%arg0: i32) -> (i32, i32) {
    %c0_i32 = arith.constant 0 : i32
    %c0_i32_0 = arith.constant 0 : i32
    %c0_i32_1 = arith.constant 0 : i32
    return %c0_i32, %c0_i32_0 : i32, i32
  }
  func.func @transform_1(%arg0: i32) -> (i32, i32) {
    %c0_i32 = arith.constant 0 : i32
    %c0_i32_0 = arith.constant 0 : i32
    return %arg0, %c0_i32 : i32, i32
  }
  func.func @transform_2(%arg0: i32) -> (i32, i32) {
    %c0_i32 = arith.constant 0 : i32
    %c0_i32_0 = arith.constant 0 : i32
    return %arg0, %c0_i32 : i32, i32
  }
  func.func @transform_3(%arg0: i32) -> (i32, i32) {
    %c0_i32 = arith.constant 0 : i32
    %c0_i32_0 = arith.constant 0 : i32
    return %arg0, %c0_i32 : i32, i32
  }
  func.func @transform_4(%arg0: i32) -> (i32, i32) {
    %c0_i32 = arith.constant 0 : i32
    %c0_i32_0 = arith.constant 0 : i32
    return %arg0, %c0_i32 : i32, i32
  }
}

module attributes {stable_mosaic.version = 11 : i64} {
  func.func @_conv_bn_kernel(%arg0: i32, %arg1: memref<16x256xf32, #tpu.memory_space<vmem>>, %arg2: memref<16x48xf32, #tpu.memory_space<vmem>>, %arg3: memref<16x1xf32, #tpu.memory_space<vmem>>, %arg4: memref<16x1xf32, #tpu.memory_space<vmem>>, %arg5: memref<16x256xf32, #tpu.memory_space<vmem>>) attributes {dimension_semantics = [#tpu.dimension_semantics<parallel>], iteration_bounds = array<i64: 1>, scalar_prefetch = 0 : i64, scratch_operands = 0 : i64, tpu.core_type = #tpu.core_type<tc>, window_params = [{pipeline_mode = #tpu.pipeline_mode<synchronous>, transform_indices = @transform_0, window_bounds = array<i64: 16, 256>}, {transform_indices = @transform_1, window_bounds = array<i64: 16, 48>}, {transform_indices = @transform_2, window_bounds = array<i64: 16, 1>}, {transform_indices = @transform_3, window_bounds = array<i64: 16, 1>}, {transform_indices = @transform_4, window_bounds = array<i64: 16, 256>}]} {
    %c0 = arith.constant 0 : index
    %c0_0 = arith.constant 0 : index
    %0 = vector.load %arg1[%c0, %c0_0] : memref<16x256xf32, #tpu.memory_space<vmem>>, vector<16x256xf32>
    %1 = tpu.iota {dimensions = array<i32: 1>} : vector<1x256xi32>
    %c128_i32 = arith.constant 128 : i32
    %c0_i32 = arith.constant 0 : i32
    %2 = arith.cmpi eq, %c128_i32, %c0_i32 : i32
    %c1_i32 = arith.constant 1 : i32
    %3 = arith.select %2, %c1_i32, %c128_i32 : i32
    %4 = vector.broadcast %3 : i32 to vector<1x256xi32>
    %5 = arith.remsi %1, %4 : vector<1x256xi32>
    %c0_i32_1 = arith.constant 0 : i32
    %6 = vector.broadcast %c0_i32_1 : i32 to vector<1x256xi32>
    %7 = arith.cmpi ne, %5, %6 : vector<1x256xi32>
    %c0_i32_2 = arith.constant 0 : i32
    %8 = vector.broadcast %c0_i32_2 : i32 to vector<1x256xi32>
    %9 = arith.cmpi slt, %5, %8 : vector<1x256xi32>
    %c0_i32_3 = arith.constant 0 : i32
    %10 = arith.cmpi slt, %3, %c0_i32_3 : i32
    %11 = vector.broadcast %10 : i1 to vector<1x256xi1>
    %12 = vector.broadcast %11 : vector<1x256xi1> to vector<1x256xi1>
    %13 = arith.xori %9, %12 : vector<1x256xi1>
    %14 = arith.andi %13, %7 : vector<1x256xi1>
    %15 = vector.broadcast %3 : i32 to vector<1x256xi32>
    %16 = arith.addi %5, %15 : vector<1x256xi32>
    %17 = arith.select %14, %16, %5 : vector<1x256xi1>, vector<1x256xi32>
    %cst = arith.constant 0.000000e+00 : f32
    %18 = vector.broadcast %cst : f32 to vector<16x1xf32>
    %19 = vector.extract_strided_slice %0 {offsets = [0, 0], sizes = [16, 255], strides = [1, 1]} : vector<16x256xf32> to vector<16x255xf32>
    %20 = tpu.concatenate %18, %19 in 1 : vector<16x1xf32>, vector<16x255xf32> -> vector<16x256xf32>
    %21 = vector.extract_strided_slice %0 {offsets = [0, 1], sizes = [16, 255], strides = [1, 1]} : vector<16x256xf32> to vector<16x255xf32>
    %22 = tpu.concatenate %21, %18 in 1 : vector<16x255xf32>, vector<16x1xf32> -> vector<16x256xf32>
    %c0_i32_4 = arith.constant 0 : i32
    %23 = vector.broadcast %c0_i32_4 : i32 to vector<1x256xi32>
    %24 = arith.cmpi eq, %17, %23 : vector<1x256xi32>
    %cst_5 = arith.constant 0.000000e+00 : f32
    %25 = vector.shape_cast %24 : vector<1x256xi1> to vector<1x256xi1>
    %26 = vector.broadcast %25 : vector<1x256xi1> to vector<16x256xi1>
    %27 = vector.broadcast %cst_5 : f32 to vector<16x256xf32>
    %28 = arith.select %26, %27, %20 : vector<16x256xi1>, vector<16x256xf32>
    %c127_i32 = arith.constant 127 : i32
    %29 = vector.broadcast %c127_i32 : i32 to vector<1x256xi32>
    %30 = arith.cmpi eq, %17, %29 : vector<1x256xi32>
    %cst_6 = arith.constant 0.000000e+00 : f32
    %31 = vector.shape_cast %30 : vector<1x256xi1> to vector<1x256xi1>
    %32 = vector.broadcast %31 : vector<1x256xi1> to vector<16x256xi1>
    %33 = vector.broadcast %cst_6 : f32 to vector<16x256xf32>
    %34 = arith.select %32, %33, %22 : vector<16x256xi1>, vector<16x256xf32>
    %35 = tpu.concatenate %28, %0, %34 in 0 : vector<16x256xf32>, vector<16x256xf32>, vector<16x256xf32> -> vector<48x256xf32>
    %c0_7 = arith.constant 0 : index
    %c0_8 = arith.constant 0 : index
    %36 = vector.load %arg2[%c0_7, %c0_8] : memref<16x48xf32, #tpu.memory_space<vmem>>, vector<16x48xf32>
    %cst_9 = arith.constant dense<0.000000e+00> : vector<16x256xf32>
    %37 = tpu.matmul %36, %35, %cst_9 {dimension_numbers = #tpu.dot_dimension_numbers<[1], [0], [0], [1], [0, 0, 1, 1], [], []>} : vector<16x48xf32>, vector<48x256xf32>, vector<16x256xf32> -> vector<16x256xf32>
    %cst_10 = arith.constant dense<0.000000e+00> : vector<16xf32>
    %38 = vector.multi_reduction <add>, %37, %cst_10 [1] : vector<16x256xf32> to vector<16xf32>
    %39 = vector.shape_cast %38 : vector<16xf32> to vector<16x1xf32>
    %cst_11 = arith.constant 2.560000e+02 : f32
    %40 = vector.broadcast %cst_11 : f32 to vector<16x1xf32>
    %41 = arith.divf %39, %40 : vector<16x1xf32>
    %42 = vector.broadcast %41 : vector<16x1xf32> to vector<16x256xf32>
    %43 = arith.subf %37, %42 : vector<16x256xf32>
    %44 = arith.mulf %43, %43 : vector<16x256xf32>
    %cst_12 = arith.constant dense<0.000000e+00> : vector<16xf32>
    %45 = vector.multi_reduction <add>, %44, %cst_12 [1] : vector<16x256xf32> to vector<16xf32>
    %46 = vector.shape_cast %45 : vector<16xf32> to vector<16x1xf32>
    %cst_13 = arith.constant 2.560000e+02 : f32
    %47 = vector.broadcast %cst_13 : f32 to vector<16x1xf32>
    %48 = arith.divf %46, %47 : vector<16x1xf32>
    %cst_14 = arith.constant 9.99999974E-6 : f32
    %49 = vector.broadcast %cst_14 : f32 to vector<16x1xf32>
    %50 = arith.addf %48, %49 : vector<16x1xf32>
    %51 = math.rsqrt %50 : vector<16x1xf32>
    %52 = vector.broadcast %51 : vector<16x1xf32> to vector<16x256xf32>
    %53 = arith.mulf %43, %52 : vector<16x256xf32>
    %c0_15 = arith.constant 0 : index
    %c0_16 = arith.constant 0 : index
    %54 = vector.load %arg3[%c0_15, %c0_16] : memref<16x1xf32, #tpu.memory_space<vmem>>, vector<16x1xf32>
    %55 = vector.broadcast %54 : vector<16x1xf32> to vector<16x256xf32>
    %56 = arith.mulf %53, %55 : vector<16x256xf32>
    %c0_17 = arith.constant 0 : index
    %c0_18 = arith.constant 0 : index
    %57 = vector.load %arg4[%c0_17, %c0_18] : memref<16x1xf32, #tpu.memory_space<vmem>>, vector<16x1xf32>
    %58 = vector.broadcast %57 : vector<16x1xf32> to vector<16x256xf32>
    %59 = arith.addf %56, %58 : vector<16x256xf32>
    %cst_19 = arith.constant 0.000000e+00 : f32
    %60 = vector.broadcast %cst_19 : f32 to vector<16x256xf32>
    %61 = arith.maximumf %59, %60 : vector<16x256xf32>
    %c0_20 = arith.constant 0 : index
    %c0_21 = arith.constant 0 : index
    %62 = vector.load %arg5[%c0_20, %c0_21] : memref<16x256xf32, #tpu.memory_space<vmem>>, vector<16x256xf32>
    tpu.vector_store %arg5[%c0_20, %c0_21], %61 {strides = array<i32>} : memref<16x256xf32, #tpu.memory_space<vmem>>, vector<16x256xf32>,
    return
  }
  func.func @transform_0(%arg0: i32) -> (i32, i32) {
    %c0_i32 = arith.constant 0 : i32
    %c0_i32_0 = arith.constant 0 : i32
    %c0_i32_1 = arith.constant 0 : i32
    return %c0_i32, %c0_i32_0 : i32, i32
  }
  func.func @transform_1(%arg0: i32) -> (i32, i32) {
    %c0_i32 = arith.constant 0 : i32
    %c0_i32_0 = arith.constant 0 : i32
    return %arg0, %c0_i32 : i32, i32
  }
  func.func @transform_2(%arg0: i32) -> (i32, i32) {
    %c0_i32 = arith.constant 0 : i32
    %c0_i32_0 = arith.constant 0 : i32
    return %arg0, %c0_i32 : i32, i32
  }
  func.func @transform_3(%arg0: i32) -> (i32, i32) {
    %c0_i32 = arith.constant 0 : i32
    %c0_i32_0 = arith.constant 0 : i32
    return %arg0, %c0_i32 : i32, i32
  }
  func.func @transform_4(%arg0: i32) -> (i32, i32) {
    %c0_i32 = arith.constant 0 : i32
    %c0_i32_0 = arith.constant 0 : i32
    return %arg0, %c0_i32 : i32, i32
  }
}

module attributes {stable_mosaic.version = 11 : i64} {
  func.func @_shrink_apply_tiled_kernel(%arg0: i32, %arg1: i32, %arg2: memref<16x128xf32, #tpu.memory_space<vmem>>, %arg3: memref<16x128xf32, #tpu.memory_space<vmem>>, %arg4: memref<16x2xf32, #tpu.memory_space<vmem>>, %arg5: memref<16x128xf32, #tpu.memory_space<vmem>>) attributes {dimension_semantics = [#tpu.dimension_semantics<parallel>, #tpu.dimension_semantics<parallel>], iteration_bounds = array<i64: 2, 1>, scalar_prefetch = 0 : i64, scratch_operands = 0 : i64, tpu.core_type = #tpu.core_type<tc>, window_params = [{transform_indices = @transform_0, window_bounds = array<i64: 16, 128>}, {transform_indices = @transform_1, window_bounds = array<i64: 16, 128>}, {pipeline_mode = #tpu.pipeline_mode<synchronous>, transform_indices = @transform_2, window_bounds = array<i64: 16, 2>}, {transform_indices = @transform_3, window_bounds = array<i64: 16, 128>}]} {
    %c0 = arith.constant 0 : index
    %c0_0 = arith.constant 0 : index
    %0 = vector.load %arg4[%c0, %c0_0] : memref<16x2xf32, #tpu.memory_space<vmem>>, vector<16x2xf32>
    %1 = tpu.iota {dimensions = array<i32: 1>} : vector<16x2xi32>
    %2 = vector.broadcast %arg0 : i32 to vector<16x2xi32>
    %3 = arith.cmpi eq, %1, %2 : vector<16x2xi32>
    %cst = arith.constant 0.000000e+00 : f32
    %4 = vector.broadcast %cst : f32 to vector<16x2xf32>
    %5 = arith.select %3, %0, %4 : vector<16x2xi1>, vector<16x2xf32>
    %cst_1 = arith.constant dense<0.000000e+00> : vector<16xf32>
    %6 = vector.multi_reduction <add>, %5, %cst_1 [1] : vector<16x2xf32> to vector<16xf32>
    %7 = vector.shape_cast %6 : vector<16xf32> to vector<16x1xf32>
    %c0_2 = arith.constant 0 : index
    %c0_3 = arith.constant 0 : index
    %8 = vector.load %arg2[%c0_2, %c0_3] : memref<16x128xf32, #tpu.memory_space<vmem>>, vector<16x128xf32>
    %c0_4 = arith.constant 0 : index
    %c0_5 = arith.constant 0 : index
    %9 = vector.load %arg3[%c0_4, %c0_5] : memref<16x128xf32, #tpu.memory_space<vmem>>, vector<16x128xf32>
    %10 = math.absf %8 : vector<16x128xf32>
    %11 = vector.broadcast %7 : vector<16x1xf32> to vector<16x128xf32>
    %12 = arith.subf %10, %11 : vector<16x128xf32>
    %cst_6 = arith.constant 0.000000e+00 : f32
    %13 = vector.broadcast %cst_6 : f32 to vector<16x128xf32>
    %14 = arith.maximumf %12, %13 : vector<16x128xf32>
    %cst_7 = arith.constant 0.000000e+00 : f32
    %15 = vector.broadcast %cst_7 : f32 to vector<16x128xf32>
    %16 = arith.cmpf ogt, %8, %15 : vector<16x128xf32>
    %cst_8 = arith.constant 0.000000e+00 : f32
    %17 = vector.broadcast %cst_8 : f32 to vector<16x128xf32>
    %18 = arith.cmpf olt, %8, %17 : vector<16x128xf32>
    %cst_9 = arith.constant -1.000000e+00 : f32
    %cst_10 = arith.constant 0.000000e+00 : f32
    %19 = vector.broadcast %cst_9 : f32 to vector<16x128xf32>
    %20 = vector.broadcast %cst_10 : f32 to vector<16x128xf32>
    %21 = arith.select %18, %19, %20 : vector<16x128xi1>, vector<16x128xf32>
    %cst_11 = arith.constant 1.000000e+00 : f32
    %22 = vector.broadcast %cst_11 : f32 to vector<16x128xf32>
    %23 = arith.select %16, %22, %21 : vector<16x128xi1>, vector<16x128xf32>
    %24 = arith.mulf %23, %14 : vector<16x128xf32>
    %25 = arith.addf %24, %9 : vector<16x128xf32>
    %c0_12 = arith.constant 0 : index
    %c0_13 = arith.constant 0 : index
    %26 = vector.load %arg5[%c0_12, %c0_13] : memref<16x128xf32, #tpu.memory_space<vmem>>, vector<16x128xf32>
    tpu.vector_store %arg5[%c0_12, %c0_13], %25 {strides = array<i32>} : memref<16x128xf32, #tpu.memory_space<vmem>>, vector<16x128xf32>,
    return
  }
  func.func @transform_0(%arg0: i32, %arg1: i32) -> (i32, i32) {
    %c1_i32 = arith.constant 1 : i32
    %0 = arith.muli %arg0, %c1_i32 : i32
    %1 = arith.addi %0, %arg1 : i32
    %c0_i32 = arith.constant 0 : i32
    %c0_i32_0 = arith.constant 0 : i32
    return %c0_i32, %1 : i32, i32
  }
  func.func @transform_1(%arg0: i32, %arg1: i32) -> (i32, i32) {
    %c1_i32 = arith.constant 1 : i32
    %0 = arith.muli %arg0, %c1_i32 : i32
    %1 = arith.addi %0, %arg1 : i32
    %c0_i32 = arith.constant 0 : i32
    %c0_i32_0 = arith.constant 0 : i32
    return %c0_i32, %1 : i32, i32
  }
  func.func @transform_2(%arg0: i32, %arg1: i32) -> (i32, i32) {
    %c0_i32 = arith.constant 0 : i32
    %c0_i32_0 = arith.constant 0 : i32
    %c0_i32_1 = arith.constant 0 : i32
    return %c0_i32, %c0_i32_0 : i32, i32
  }
  func.func @transform_3(%arg0: i32, %arg1: i32) -> (i32, i32) {
    %c1_i32 = arith.constant 1 : i32
    %0 = arith.muli %arg0, %c1_i32 : i32
    %1 = arith.addi %0, %arg1 : i32
    %c0_i32 = arith.constant 0 : i32
    %c0_i32_0 = arith.constant 0 : i32
    return %c0_i32, %1 : i32, i32
  }
}

module attributes {stable_mosaic.version = 11 : i64} {
  func.func @_shrink_thr_kernel(%arg0: memref<16x256xf32, #tpu.memory_space<vmem>>, %arg1: memref<16x16xf32, #tpu.memory_space<vmem>>, %arg2: memref<16x1xf32, #tpu.memory_space<vmem>>, %arg3: memref<16x1xf32, #tpu.memory_space<vmem>>, %arg4: memref<16x1xf32, #tpu.memory_space<vmem>>, %arg5: memref<16x16xf32, #tpu.memory_space<vmem>>, %arg6: memref<16x1xf32, #tpu.memory_space<vmem>>, %arg7: memref<16x16xf32, #tpu.memory_space<vmem>>, %arg8: memref<16x16xf32, #tpu.memory_space<vmem>>, %arg9: memref<16x1xf32, #tpu.memory_space<vmem>>, %arg10: memref<16x2xf32, #tpu.memory_space<vmem>>) attributes {dimension_semantics = [], scalar_prefetch = 0 : i64, scratch_operands = 0 : i64, tpu.core_type = #tpu.core_type<tc>} {
    %c0 = arith.constant 0 : index
    %c0_0 = arith.constant 0 : index
    %0 = vector.load %arg0[%c0, %c0_0] : memref<16x256xf32, #tpu.memory_space<vmem>>, vector<16x256xf32>
    %1 = vector.extract_strided_slice %0 {offsets = [0, 0], sizes = [16, 128], strides = [1, 1]} : vector<16x256xf32> to vector<16x128xf32>
    %cst = arith.constant dense<0.000000e+00> : vector<16xf32>
    %2 = vector.multi_reduction <add>, %1, %cst [1] : vector<16x128xf32> to vector<16xf32>
    %3 = vector.shape_cast %2 : vector<16xf32> to vector<16x1xf32>
    %cst_1 = arith.constant 1.280000e+02 : f32
    %4 = vector.broadcast %cst_1 : f32 to vector<16x1xf32>
    %5 = arith.divf %3, %4 : vector<16x1xf32>
    %6 = vector.extract_strided_slice %1 {offsets = [0, 0], sizes = [16, 64], strides = [1, 1]} : vector<16x128xf32> to vector<16x64xf32>
    %cst_2 = arith.constant dense<0xFF800000> : vector<16xf32>
    %7 = vector.multi_reduction <maximumf>, %6, %cst_2 [1] : vector<16x64xf32> to vector<16xf32>
    %8 = vector.shape_cast %7 : vector<16xf32> to vector<16x1xf32>
    %9 = vector.extract_strided_slice %1 {offsets = [0, 64], sizes = [16, 64], strides = [1, 1]} : vector<16x128xf32> to vector<16x64xf32>
    %cst_3 = arith.constant dense<0xFF800000> : vector<16xf32>
    %10 = vector.multi_reduction <maximumf>, %9, %cst_3 [1] : vector<16x64xf32> to vector<16xf32>
    %11 = vector.shape_cast %10 : vector<16xf32> to vector<16x1xf32>
    %12 = arith.addf %8, %11 : vector<16x1xf32>
    %cst_4 = arith.constant 5.000000e-01 : f32
    %13 = vector.broadcast %cst_4 : f32 to vector<16x1xf32>
    %14 = arith.mulf %12, %13 : vector<16x1xf32>
    %15 = vector.extract_strided_slice %0 {offsets = [0, 128], sizes = [16, 128], strides = [1, 1]} : vector<16x256xf32> to vector<16x128xf32>
    %cst_5 = arith.constant dense<0.000000e+00> : vector<16xf32>
    %16 = vector.multi_reduction <add>, %15, %cst_5 [1] : vector<16x128xf32> to vector<16xf32>
    %17 = vector.shape_cast %16 : vector<16xf32> to vector<16x1xf32>
    %cst_6 = arith.constant 1.280000e+02 : f32
    %18 = vector.broadcast %cst_6 : f32 to vector<16x1xf32>
    %19 = arith.divf %17, %18 : vector<16x1xf32>
    %20 = vector.extract_strided_slice %15 {offsets = [0, 0], sizes = [16, 64], strides = [1, 1]} : vector<16x128xf32> to vector<16x64xf32>
    %cst_7 = arith.constant dense<0xFF800000> : vector<16xf32>
    %21 = vector.multi_reduction <maximumf>, %20, %cst_7 [1] : vector<16x64xf32> to vector<16xf32>
    %22 = vector.shape_cast %21 : vector<16xf32> to vector<16x1xf32>
    %23 = vector.extract_strided_slice %15 {offsets = [0, 64], sizes = [16, 64], strides = [1, 1]} : vector<16x128xf32> to vector<16x64xf32>
    %cst_8 = arith.constant dense<0xFF800000> : vector<16xf32>
    %24 = vector.multi_reduction <maximumf>, %23, %cst_8 [1] : vector<16x64xf32> to vector<16xf32>
    %25 = vector.shape_cast %24 : vector<16xf32> to vector<16x1xf32>
    %26 = arith.addf %22, %25 : vector<16x1xf32>
    %cst_9 = arith.constant 5.000000e-01 : f32
    %27 = vector.broadcast %cst_9 : f32 to vector<16x1xf32>
    %28 = arith.mulf %26, %27 : vector<16x1xf32>
    %29 = tpu.concatenate %5, %19 in 1 : vector<16x1xf32>, vector<16x1xf32> -> vector<16x2xf32>
    %30 = tpu.concatenate %14, %28 in 1 : vector<16x1xf32>, vector<16x1xf32> -> vector<16x2xf32>
    %c0_10 = arith.constant 0 : index
    %c0_11 = arith.constant 0 : index
    %31 = vector.load %arg1[%c0_10, %c0_11] : memref<16x16xf32, #tpu.memory_space<vmem>>, vector<16x16xf32>
    %c0_12 = arith.constant 0 : index
    %c0_13 = arith.constant 0 : index
    %32 = vector.load %arg2[%c0_12, %c0_13] : memref<16x1xf32, #tpu.memory_space<vmem>>, vector<16x1xf32>
    %c0_14 = arith.constant 0 : index
    %c0_15 = arith.constant 0 : index
    %33 = vector.load %arg3[%c0_14, %c0_15] : memref<16x1xf32, #tpu.memory_space<vmem>>, vector<16x1xf32>
    %c0_16 = arith.constant 0 : index
    %c0_17 = arith.constant 0 : index
    %34 = vector.load %arg4[%c0_16, %c0_17] : memref<16x1xf32, #tpu.memory_space<vmem>>, vector<16x1xf32>
    %c0_18 = arith.constant 0 : index
    %c0_19 = arith.constant 0 : index
    %35 = vector.load %arg5[%c0_18, %c0_19] : memref<16x16xf32, #tpu.memory_space<vmem>>, vector<16x16xf32>
    %c0_20 = arith.constant 0 : index
    %c0_21 = arith.constant 0 : index
    %36 = vector.load %arg6[%c0_20, %c0_21] : memref<16x1xf32, #tpu.memory_space<vmem>>, vector<16x1xf32>
    %cst_22 = arith.constant dense<0.000000e+00> : vector<16x2xf32>
    %37 = tpu.matmul %31, %29, %cst_22 {dimension_numbers = #tpu.dot_dimension_numbers<[1], [0], [0], [1], [0, 0, 1, 1], [], []>} : vector<16x16xf32>, vector<16x2xf32>, vector<16x2xf32> -> vector<16x2xf32>
    %38 = vector.broadcast %32 : vector<16x1xf32> to vector<16x2xf32>
    %39 = arith.addf %37, %38 : vector<16x2xf32>
    %cst_23 = arith.constant dense<0.000000e+00> : vector<16xf32>
    %40 = vector.multi_reduction <add>, %39, %cst_23 [1] : vector<16x2xf32> to vector<16xf32>
    %41 = vector.shape_cast %40 : vector<16xf32> to vector<16x1xf32>
    %cst_24 = arith.constant 2.000000e+00 : f32
    %42 = vector.broadcast %cst_24 : f32 to vector<16x1xf32>
    %43 = arith.divf %41, %42 : vector<16x1xf32>
    %44 = vector.broadcast %43 : vector<16x1xf32> to vector<16x2xf32>
    %45 = arith.subf %39, %44 : vector<16x2xf32>
    %46 = arith.mulf %45, %45 : vector<16x2xf32>
    %cst_25 = arith.constant dense<0.000000e+00> : vector<16xf32>
    %47 = vector.multi_reduction <add>, %46, %cst_25 [1] : vector<16x2xf32> to vector<16xf32>
    %48 = vector.shape_cast %47 : vector<16xf32> to vector<16x1xf32>
    %cst_26 = arith.constant 2.000000e+00 : f32
    %49 = vector.broadcast %cst_26 : f32 to vector<16x1xf32>
    %50 = arith.divf %48, %49 : vector<16x1xf32>
    %cst_27 = arith.constant 9.99999974E-6 : f32
    %51 = vector.broadcast %cst_27 : f32 to vector<16x1xf32>
    %52 = arith.addf %50, %51 : vector<16x1xf32>
    %53 = math.rsqrt %52 : vector<16x1xf32>
    %54 = vector.broadcast %53 : vector<16x1xf32> to vector<16x2xf32>
    %55 = arith.mulf %45, %54 : vector<16x2xf32>
    %56 = vector.broadcast %33 : vector<16x1xf32> to vector<16x2xf32>
    %57 = arith.mulf %55, %56 : vector<16x2xf32>
    %58 = vector.broadcast %34 : vector<16x1xf32> to vector<16x2xf32>
    %59 = arith.addf %57, %58 : vector<16x2xf32>
    %cst_28 = arith.constant 0.000000e+00 : f32
    %60 = vector.broadcast %cst_28 : f32 to vector<16x2xf32>
    %61 = arith.maximumf %59, %60 : vector<16x2xf32>
    %cst_29 = arith.constant dense<0.000000e+00> : vector<16x2xf32>
    %62 = tpu.matmul %35, %61, %cst_29 {dimension_numbers = #tpu.dot_dimension_numbers<[1], [0], [0], [1], [0, 0, 1, 1], [], []>} : vector<16x16xf32>, vector<16x2xf32>, vector<16x2xf32> -> vector<16x2xf32>
    %63 = vector.broadcast %36 : vector<16x1xf32> to vector<16x2xf32>
    %64 = arith.addf %62, %63 : vector<16x2xf32>
    %65 = arith.negf %64 : vector<16x2xf32>
    %66 = math.exp %65 : vector<16x2xf32>
    %cst_30 = arith.constant 1.000000e+00 : f32
    %67 = vector.broadcast %cst_30 : f32 to vector<16x2xf32>
    %68 = arith.addf %67, %66 : vector<16x2xf32>
    %69 = arith.divf %67, %68 : vector<16x2xf32>
    %70 = arith.mulf %29, %69 : vector<16x2xf32>
    %cst_31 = arith.constant dense<0.000000e+00> : vector<16x2xf32>
    %71 = tpu.matmul %31, %30, %cst_31 {dimension_numbers = #tpu.dot_dimension_numbers<[1], [0], [0], [1], [0, 0, 1, 1], [], []>} : vector<16x16xf32>, vector<16x2xf32>, vector<16x2xf32> -> vector<16x2xf32>
    %72 = vector.broadcast %32 : vector<16x1xf32> to vector<16x2xf32>
    %73 = arith.addf %71, %72 : vector<16x2xf32>
    %cst_32 = arith.constant dense<0.000000e+00> : vector<16xf32>
    %74 = vector.multi_reduction <add>, %73, %cst_32 [1] : vector<16x2xf32> to vector<16xf32>
    %75 = vector.shape_cast %74 : vector<16xf32> to vector<16x1xf32>
    %cst_33 = arith.constant 2.000000e+00 : f32
    %76 = vector.broadcast %cst_33 : f32 to vector<16x1xf32>
    %77 = arith.divf %75, %76 : vector<16x1xf32>
    %78 = vector.broadcast %77 : vector<16x1xf32> to vector<16x2xf32>
    %79 = arith.subf %73, %78 : vector<16x2xf32>
    %80 = arith.mulf %79, %79 : vector<16x2xf32>
    %cst_34 = arith.constant dense<0.000000e+00> : vector<16xf32>
    %81 = vector.multi_reduction <add>, %80, %cst_34 [1] : vector<16x2xf32> to vector<16xf32>
    %82 = vector.shape_cast %81 : vector<16xf32> to vector<16x1xf32>
    %cst_35 = arith.constant 2.000000e+00 : f32
    %83 = vector.broadcast %cst_35 : f32 to vector<16x1xf32>
    %84 = arith.divf %82, %83 : vector<16x1xf32>
    %cst_36 = arith.constant 9.99999974E-6 : f32
    %85 = vector.broadcast %cst_36 : f32 to vector<16x1xf32>
    %86 = arith.addf %84, %85 : vector<16x1xf32>
    %87 = math.rsqrt %86 : vector<16x1xf32>
    %88 = vector.broadcast %87 : vector<16x1xf32> to vector<16x2xf32>
    %89 = arith.mulf %79, %88 : vector<16x2xf32>
    %90 = vector.broadcast %33 : vector<16x1xf32> to vector<16x2xf32>
    %91 = arith.mulf %89, %90 : vector<16x2xf32>
    %92 = vector.broadcast %34 : vector<16x1xf32> to vector<16x2xf32>
    %93 = arith.addf %91, %92 : vector<16x2xf32>
    %cst_37 = arith.constant 0.000000e+00 : f32
    %94 = vector.broadcast %cst_37 : f32 to vector<16x2xf32>
    %95 = arith.maximumf %93, %94 : vector<16x2xf32>
    %cst_38 = arith.constant dense<0.000000e+00> : vector<16x2xf32>
    %96 = tpu.matmul %35, %95, %cst_38 {dimension_numbers = #tpu.dot_dimension_numbers<[1], [0], [0], [1], [0, 0, 1, 1], [], []>} : vector<16x16xf32>, vector<16x2xf32>, vector<16x2xf32> -> vector<16x2xf32>
    %97 = vector.broadcast %36 : vector<16x1xf32> to vector<16x2xf32>
    %98 = arith.addf %96, %97 : vector<16x2xf32>
    %99 = arith.negf %98 : vector<16x2xf32>
    %100 = math.exp %99 : vector<16x2xf32>
    %cst_39 = arith.constant 1.000000e+00 : f32
    %101 = vector.broadcast %cst_39 : f32 to vector<16x2xf32>
    %102 = arith.addf %101, %100 : vector<16x2xf32>
    %103 = arith.divf %101, %102 : vector<16x2xf32>
    %104 = arith.mulf %30, %103 : vector<16x2xf32>
    %c0_40 = arith.constant 0 : index
    %c0_41 = arith.constant 0 : index
    %105 = vector.load %arg7[%c0_40, %c0_41] : memref<16x16xf32, #tpu.memory_space<vmem>>, vector<16x16xf32>
    %cst_42 = arith.constant dense<0.000000e+00> : vector<16x2xf32>
    %106 = tpu.matmul %105, %70, %cst_42 {dimension_numbers = #tpu.dot_dimension_numbers<[1], [0], [0], [1], [0, 0, 1, 1], [], []>} : vector<16x16xf32>, vector<16x2xf32>, vector<16x2xf32> -> vector<16x2xf32>
    %c0_43 = arith.constant 0 : index
    %c0_44 = arith.constant 0 : index
    %107 = vector.load %arg8[%c0_43, %c0_44] : memref<16x16xf32, #tpu.memory_space<vmem>>, vector<16x16xf32>
    %cst_45 = arith.constant dense<0.000000e+00> : vector<16x2xf32>
    %108 = tpu.matmul %107, %104, %cst_45 {dimension_numbers = #tpu.dot_dimension_numbers<[1], [0], [0], [1], [0, 0, 1, 1], [], []>} : vector<16x16xf32>, vector<16x2xf32>, vector<16x2xf32> -> vector<16x2xf32>
    %109 = arith.addf %106, %108 : vector<16x2xf32>
    %c0_46 = arith.constant 0 : index
    %c0_47 = arith.constant 0 : index
    %110 = vector.load %arg9[%c0_46, %c0_47] : memref<16x1xf32, #tpu.memory_space<vmem>>, vector<16x1xf32>
    %111 = vector.broadcast %110 : vector<16x1xf32> to vector<16x2xf32>
    %112 = arith.addf %109, %111 : vector<16x2xf32>
    %c0_48 = arith.constant 0 : index
    %c0_49 = arith.constant 0 : index
    %113 = vector.load %arg10[%c0_48, %c0_49] : memref<16x2xf32, #tpu.memory_space<vmem>>, vector<16x2xf32>
    tpu.vector_store %arg10[%c0_48, %c0_49], %112 {strides = array<i32>} : memref<16x2xf32, #tpu.memory_space<vmem>>, vector<16x2xf32>,
    return
  }
}

</mosaic_0001>

<bundles_post_ra>
// kernel: basic_block2_forward.14
= control target key start
LH: loop header
LB: loop body
LE: loop exit
PB: predicated region body
PF: predicated region fallthrough
CT: control target
= control target key end

     0   :  { %s393_s12 = smov 0   ;;  %s395_s13 = smov 0   ;;  %s432_s0 = inlined_call_operand.vmem [shape: f32[8,256], index: 0, kind: input, shape index: {}]   ;;  %s433_s1 = inlined_call_operand.vmem [shape: f32[8,256], index: 1, kind: input, shape index: {}]   ;;  %s434_s2 = inlined_call_operand.vmem [shape: f32[8,2], index: 2, kind: input, shape index: {}]   ;;  %s435_s3 = inlined_call_operand.vmem [shape: f32[8,256], index: 3, kind: output, shape index: {}]  }
   0x1   :  { %s397_s14 = smov 0  }
   0x2 LB: > { %s25_s15 = sadd.s32 1, %s366_s13  ;;  %p317_p0 = scmp.ge.s32.totalorder %s370_s14, 1  ;;  %s370_s14 = sphi %s397_s14, %s13_s14   ;;  %s366_s13 = sphi %s395_s13, %s437_s13   ;;  %s362_s12 = sphi %s393_s12, %s436_s12  }
   0x3   : > { %p27_p1 = scmp.ge.s32.totalorder %s25_s15, 2  ;;  %p167_p2 = scmp.lt.s32.totalorder %s370_s14, 3 }
   0x5   : > { %s439_s15 = smov (%p27_p1, %s25_s15), 0  ;;  %p168_p3 = pnand %p317_p0, %p167_p2 }
   0x6   : > { %p197_p4 = scmp.lt.s32.totalorder (!%p168_p3), %s362_s12, 1 }
   0x7   : > { %171 = sbr.rel (%p168_p3) target bundleno = 166 (0xa6), region = 32 }
   0xc   : > { %v215_v0 = vlaneseq  ;;  %v217_v1 = vstv %s362_s12  ;;  %v214_v2 = vld [vmem:[%s434_s2] sm:$0xff]  ;;  %vm220_vm0 = vcmask 15360   ;;  %s441_s12 = smov (!%p197_p4, %s362_s12), 1  ;;  %v372_v8 = vmov 0.0  }
   0xd   : > { %s318_s18 = sshll.u32 %s441_s12, 3 }
   0xe   : > { %v216_v3 = vand.u32 127, %v215_v0  ;;  %s200_s21 = scalar_lea.vmem %s432_s0, %s318_s18  ;;  %s206_s24 = scalar_lea.vmem %s433_s1, %s318_s18 }
   0xf   : > { %v224_v6 = vld [vmem:[%s200_s21] sm:$0xff]  ;;  %s212_s27 = scalar_lea.vmem %s435_s3, %s318_s18 }
  0x10   : > { %vm218_vm1 = vcmp.eq.s32.totalorder %v216_v3, %v217_v1  ;;  %vm230_vm2 = vcmp.lt.f32.partialorder %v224_v6, 0.0  ;;  %v226_v7 = vand.u32 2147483647, %v224_v6  ;;  %vm229_vm3 = vcmp.gt.f32.partialorder %v224_v6, 0.0  ;;  %v225_v14 = vld [vmem:[%s206_s24] sm:$0xff] }
  0x11   : > { %v219_v4 = vsel %vm218_vm1, %v214_v2, 0.0  ;;  %v231_v9 = vsel %vm230_vm2, -1.0, %v372_v8 }
  0x12   : > { %v221_v5 = vsel %vm220_vm0, %v219_v4, 0.0  ;;  %v232_v12 = vsel %vm229_vm3, 1.0, %v231_v9 }
  0x13   : > { %222 = vadd.xlane.f32.xlu0 %v221_v5 }
  0x9c   : > { %v223_v10 = vpop.xlane.xlu0 %222 }
  0x9d   : > { %v227_v11 = vsub.f32 %v226_v7, %v223_v10 }
  0x9f   : > { %v228_v13 = vmax.f32 %v227_v11, 0.0 }
  0xa1   : > { %v233_v15 = vmul.f32 %v232_v12, %v228_v13 }
  0xa3   : > { %v234_v16 = vadd.f32 %v233_v15, %v225_v14 }
  0xa5   : > { %235 = vst [vmem:[%s212_s27] sm:$0xff] %v234_v16 }
  0xa6 PF: > { %s13_s14 = sadd.s32 1, %s370_s14   ;;  %s436_s12 = smov %s366_s13 }
  0xa7   : > { %p10_p5 = scmp.ge.s32.totalorder %s13_s14, 4   ;;  %s437_s13 = smov %s439_s15 }
  0xa9   :  { %12 = sbr.rel (!%p10_p5) target bundleno = 2 (0x2), region = 65 }

// kernel: basic_block2_forward.10
= control target key start
LH: loop header
LB: loop body
LE: loop exit
PB: predicated region body
PF: predicated region fallthrough
CT: control target
= control target key end

     0   :  { %v220_v2 = vmov 0.0   ;;  %s221_s17 = smov 1   ;;  %s222_s18 = smov 127   ;;  %v18_v3 = vlaneseq  ;;  %vm60_vm0 = vcmask 1039360   ;;  %vm83_vm2 = vcmask 1043456   ;;  %s273_s0 = inlined_call_operand.vmem [shape: f32[4,256], index: 0, kind: input, shape index: {}]   ;;  %s274_s1 = inlined_call_operand.vmem [shape: f32[8,12], index: 1, kind: input, shape index: {}]   ;;  %s275_s2 = inlined_call_operand.vmem [shape: f32[8,1], index: 2, kind: input, shape index: {}]   ;;  %s276_s3 = inlined_call_operand.vmem [shape: f32[8,1], index: 3, kind: input, shape index: {}]   ;;  %s277_s4 = inlined_call_operand.vmem [shape: f32[8,256], index: 4, kind: output, shape index: {}]  }
   0x1   :  { %v17_v0 = vld [vmem:[%s273_s0] sm:$0xff]  ;;  %161 = vmatprep.mubr.f32.mxu0 %v220_v2  ;;  %vm51_vm3 = vcmask 7168   ;;  %vm87_vm7 = vcmask 97280   ;;  %v223_v26 = vmov 0  }
   0x2   :  { %v46_v1 = vcombine.high %v17_v0, %v17_v0  ;;  %v19_v4 = vand.u32 127, %v18_v3  ;;  %v81_v11 = vcombine.low %v17_v0, %v17_v0  ;;  %v86_v22 = vld [vmem:[%s274_s1] sm:$0xff]  ;;  %214 = vset.pattern.permute.xlu0 %v223_v26  ;;  %215 = vset.pattern.permute.xlu1 %v223_v26 }
   0x3   :  { %v185_v27 = vld [vmem:[%s275_s2] sm:$0xff] }
   0x4   :  { %49 = vrot.lane.b32.xlu1 %v46_v1, %s221_s17  ;;  %58 = vrot.lane.b32.xlu0 %v46_v1, %s222_s18  ;;  %v20_v5 = vadd.s32 128, %v19_v4  ;;  %vm65_vm4 = vcmp.eq.s32.totalorder %v19_v4, 0  ;;  %vm73_vm6 = vcmp.eq.s32.totalorder %v19_v4, 127  ;;  %v193_v35 = vld [vmem:[%s276_s3] sm:$0xff] }
   0x6   :  { %v32_v6 = vand.u32 127, %v20_v5 }
   0x8   :  { %56 = vrot.lane.b32.xlu1 %v17_v0, %s222_s18  ;;  %47 = vrot.lane.b32.xlu0 %v17_v0, %s221_s17  ;;  %vm74_vm1 = vcmp.eq.s32.totalorder %v32_v6, 127  ;;  %vm66_vm5 = vcmp.eq.s32.totalorder %v32_v6, 0 }
  0x76   :  { %v50_v7 = vpop.permute.xlu1 %49  ;;  %v59_v8 = vpop.permute.xlu0 %58 }
  0x77   :  { %v64_v9 = vsel %vm60_vm0, %v59_v8, 0.0 }
  0x78   :  { %v80_v10 = vsel %vm74_vm1, 0.0, %v64_v9 }
  0x79   :  { %207 = vmatprep.subr.msk.mxu0 %vm83_vm2, %v80_v10 }
  0x7a   :  { %v57_v12 = vpop.permute.xlu1 %56  ;;  %v48_v13 = vpop.permute.xlu0 %47 }
  0x7b   :  { %v61_v14 = vsel %vm60_vm0, %v57_v12, %v59_v8  ;;  %v52_v15 = vsel %vm51_vm3, %v48_v13, %v50_v7  ;;  %v55_v16 = vsel %vm51_vm3, 0.0, %v48_v13 }
  0x7c   :  { %v71_v17 = vsel %vm65_vm4, 0.0, %v55_v16  ;;  %v72_v18 = vsel %vm66_vm5, 0.0, %v52_v15  ;;  %v79_v19 = vsel %vm73_vm6, 0.0, %v61_v14 }
  0x7d   :  { %208 = vmatpush1.msk.msra.mxu0 %vm83_vm2, %v79_v19  ;;  %v85_v20 = vsel %vm83_vm2, %v72_v18, %v17_v0  ;;  %v84_v21 = vsel %vm83_vm2, %v71_v17, %v81_v11 }
  0x7e   :  { %127 = vmatprep.subr.mxu0 %v85_v20 }
  0x7f   :  { %128 = vmatpush1.msra.mxu0 %v84_v21 }
  0x80   :  { %209 = vmatmul.mubr.msk.f32.vlgmr.msra.gmra.mxu0 %vm87_vm7, %v86_v22 }
 0x140   :  { %v163_v23 = vpop.f32.mrf.mxu0 }
 0x142   :  { %v165_v24 = vpop.f32.mrf.mxu0 }
 0x143   :  { %v168_v25 = vadd.f32 %v165_v24, %v163_v23 }
 0x145   :  { %169 = vadd.xlane.f32.xlu0 %v168_v25 }
 0x15b   :  { %188 = vperm.xlu0 %214, %v185_v27  }
 0x1ce   :  { %v170_v28 = vpop.xlane.xlu0 %169 }
 0x1cf   :  { %v172_v29 = vmul.f32 0.00390625, %v170_v28 }
 0x1d1   :  { %v173_v30 = vsub.f32 %v163_v23, %v172_v29  ;;  %v174_v31 = vsub.f32 %v165_v24, %v172_v29 }
 0x1d3   :  { %v175_v32 = vmul.f32 %v173_v30, %v173_v30  ;;  %v176_v33 = vmul.f32 %v174_v31, %v174_v31 }
 0x1d5   :  { %v177_v34 = vadd.f32 %v176_v33, %v175_v32 }
 0x1d6   :  { %v189_v40 = vpop.permute.xlu0 %188 }
 0x1d7   :  { %178 = vadd.xlane.f32.xlu1 %v177_v34 }
 0x1e8   :  { %196 = vperm.xlu1 %215, %v193_v35  }
 0x260   :  { %v179_v36 = vpop.xlane.xlu1 %178 }
 0x261   :  { %v180_v37 = vmul.f32 0.00390625, %v179_v36 }
 0x263   :  { %v181_v38 = vadd.f32 1e-05, %v180_v37 }
 0x264   :  { %v197_v43 = vpop.permute.xlu1 %196 }
 0x265   :  { %218 = vrsqrt.f32 %v181_v38 }
 0x272   :  { %v219_v39 = vpop.eup %218 }
 0x273   :  { %v183_v41 = vmul.f32 %v219_v39, %v173_v30  ;;  %v184_v42 = vmul.f32 %v219_v39, %v174_v31 }
 0x275   :  { %v191_v44 = vmul.f32 %v189_v40, %v183_v41  ;;  %v192_v45 = vmul.f32 %v189_v40, %v184_v42 }
 0x277   :  { %v199_v46 = vadd.f32 %v197_v43, %v191_v44  ;;  %v200_v47 = vadd.f32 %v197_v43, %v192_v45 }
 0x279   :  { %201 = vst [vmem:[%s277_s4] sm:$0xff] %v199_v46  ;;  %202 = vst [vmem:[%s277_s4 + $0x8] sm:$0xff] %v200_v47 }

// kernel: basic_block2_forward.11
= control target key start
LH: loop header
LB: loop body
LE: loop exit
PB: predicated region body
PF: predicated region fallthrough
CT: control target
= control target key end

     0   :  { %v220_v2 = vmov 0.0   ;;  %s221_s19 = smov 127   ;;  %s222_s20 = smov 1   ;;  %v19_v3 = vlaneseq  ;;  %vm61_vm0 = vcmask 1039360   ;;  %vm52_vm3 = vcmask 7168   ;;  %s270_s0 = inlined_call_operand.vmem [shape: f32[8,256], index: 0, kind: input, shape index: {}]   ;;  %s271_s1 = inlined_call_operand.vmem [shape: f32[8,24], index: 1, kind: input, shape index: {}]   ;;  %s272_s2 = inlined_call_operand.vmem [shape: f32[8,1], index: 2, kind: input, shape index: {}]   ;;  %s273_s3 = inlined_call_operand.vmem [shape: f32[8,1], index: 3, kind: input, shape index: {}]   ;;  %s274_s4 = inlined_call_operand.vmem [shape: f32[8,256], index: 4, kind: output, shape index: {}]  }
   0x1   :  { %v18_v0 = vld [vmem:[%s270_s0 + $0x8] sm:$0xff]  ;;  %v17_v1 = vld [vmem:[%s270_s0] sm:$0xff]  ;;  %151 = vmatprep.mubr.f32.mxu0 %v220_v2  ;;  %vm83_vm6 = vcmask 195584   ;;  %v223_v19 = vmov 0  }
   0x2   :  { %59 = vrot.lane.b32.xlu0 %v18_v0, %s221_s19  ;;  %48 = vrot.lane.b32.xlu1 %v17_v1, %s222_s20  ;;  %v20_v4 = vand.u32 127, %v19_v3  ;;  %v82_v14 = vld [vmem:[%s271_s1] sm:$0xff] }
   0x3   :  { %216 = vset.pattern.permute.xlu0 %v223_v19  ;;  %v175_v20 = vld [vmem:[%s272_s2] sm:$0xff]  ;;  %217 = vset.pattern.permute.xlu1 %v223_v19 }
   0x4   :  { %v21_v5 = vadd.s32 128, %v20_v4  ;;  %vm209_vm2 = vcmp.ne.s32.totalorder %v20_v4, 127  ;;  %vm211_vm5 = vcmp.ne.s32.totalorder %v20_v4, 0  ;;  %v183_v28 = vld [vmem:[%s273_s3] sm:$0xff] }
   0x6   :  { %50 = vrot.lane.b32.xlu1 %v18_v0, %s222_s20  ;;  %57 = vrot.lane.b32.xlu0 %v17_v1, %s221_s19  ;;  %v33_v6 = vand.u32 127, %v21_v5 }
   0x8   :  { %vm208_vm1 = vcmp.ne.s32.totalorder %v33_v6, 127  ;;  %vm210_vm4 = vcmp.ne.s32.totalorder %v33_v6, 0 }
  0x74   :  { %v60_v7 = vpop.permute.xlu0 %59  ;;  %v49_v8 = vpop.permute.xlu1 %48 }
  0x75   :  { %v65_v9 = vsel %vm61_vm0, %v60_v7, 0.0  ;;  %v56_v15 = vsel %vm52_vm3, 0.0, %v49_v8 }
  0x76   :  { %200 = vmatprep.subr.msk.mxu0 %vm208_vm1, %v65_v9 }
  0x78   :  { %v58_v10 = vpop.permute.xlu0 %57  ;;  %v51_v11 = vpop.permute.xlu1 %50 }
  0x79   :  { %v62_v12 = vsel %vm61_vm0, %v58_v10, %v60_v7  ;;  %v53_v13 = vsel %vm52_vm3, %v49_v8, %v51_v11 }
  0x7a   :  { %202 = vmatpush1.msk.msra.mxu0 %vm209_vm2, %v62_v12 }
  0x7b   :  { %115 = vmatprep.subr.mxu0 %v18_v0 }
  0x7c   :  { %116 = vmatpush1.msra.mxu0 %v17_v1 }
  0x7d   :  { %204 = vmatprep.subr.msk.mxu0 %vm210_vm4, %v53_v13 }
  0x7e   :  { %206 = vmatpush1.msk.msra.mxu0 %vm211_vm5, %v56_v15 }
  0x7f   :  { %207 = vmatmul.mubr.msk.f32.vlgmr.msra.gmra.mxu0 %vm83_vm6, %v82_v14 }
 0x13f   :  { %v153_v16 = vpop.f32.mrf.mxu0 }
 0x141   :  { %v155_v17 = vpop.f32.mrf.mxu0 }
 0x142   :  { %v158_v18 = vadd.f32 %v155_v17, %v153_v16 }
 0x144   :  { %159 = vadd.xlane.f32.xlu0 %v158_v18 }
 0x15a   :  { %178 = vperm.xlu0 %216, %v175_v20  }
 0x1cd   :  { %v160_v21 = vpop.xlane.xlu0 %159 }
 0x1ce   :  { %v162_v22 = vmul.f32 0.00390625, %v160_v21 }
 0x1d0   :  { %v163_v23 = vsub.f32 %v153_v16, %v162_v22  ;;  %v164_v24 = vsub.f32 %v155_v17, %v162_v22 }
 0x1d2   :  { %v165_v25 = vmul.f32 %v163_v23, %v163_v23  ;;  %v166_v26 = vmul.f32 %v164_v24, %v164_v24 }
 0x1d4   :  { %v167_v27 = vadd.f32 %v166_v26, %v165_v25 }
 0x1d5   :  { %v179_v33 = vpop.permute.xlu0 %178 }
 0x1d6   :  { %168 = vadd.xlane.f32.xlu1 %v167_v27 }
 0x1e7   :  { %186 = vperm.xlu1 %217, %v183_v28  }
 0x25f   :  { %v169_v29 = vpop.xlane.xlu1 %168 }
 0x260   :  { %v170_v30 = vmul.f32 0.00390625, %v169_v29 }
 0x262   :  { %v171_v31 = vadd.f32 1e-05, %v170_v30 }
 0x263   :  { %v187_v36 = vpop.permute.xlu1 %186 }
 0x264   :  { %218 = vrsqrt.f32 %v171_v31 }
 0x271   :  { %v219_v32 = vpop.eup %218 }
 0x272   :  { %v173_v34 = vmul.f32 %v219_v32, %v163_v23  ;;  %v174_v35 = vmul.f32 %v219_v32, %v164_v24 }
 0x274   :  { %v181_v37 = vmul.f32 %v179_v33, %v173_v34  ;;  %v182_v38 = vmul.f32 %v179_v33, %v174_v35 }
 0x276   :  { %v189_v39 = vadd.f32 %v187_v36, %v181_v37  ;;  %v190_v40 = vadd.f32 %v187_v36, %v182_v38 }
 0x278   :  { %v191_v41 = vmax.f32 %v189_v39, 0.0  ;;  %v192_v42 = vmax.f32 %v190_v40, 0.0 }
 0x27a   :  { %193 = vst [vmem:[%s274_s4] sm:$0xff] %v191_v41  ;;  %194 = vst [vmem:[%s274_s4 + $0x8] sm:$0xff] %v192_v42 }

// kernel: basic_block2_forward.13
= control target key start
LH: loop header
LB: loop body
LE: loop exit
PB: predicated region body
PF: predicated region fallthrough
CT: control target
= control target key end

     0   :  { %vm41_vm0 = vcmask 523264   ;;  %vm45_vm1 = vcmask 1048064   ;;  %v653_v6 = vmov 0.0   ;;  %vm654_vm2 = vmmov 0   ;;  %s786_s0 = inlined_call_operand.vmem [shape: f32[8,256], index: 0, kind: input, shape index: {}]   ;;  %s787_s2 = inlined_call_operand.vmem [shape: f32[8,1], index: 2, kind: input, shape index: {}]   ;;  %s788_s1 = inlined_call_operand.vmem [shape: f32[8,8], index: 1, kind: input, shape index: {}]   ;;  %s789_s3 = inlined_call_operand.vmem [shape: f32[8,1], index: 3, kind: input, shape index: {}]   ;;  %s790_s4 = inlined_call_operand.vmem [shape: f32[8,1], index: 4, kind: input, shape index: {}]   ;;  %s791_s6 = inlined_call_operand.vmem [shape: f32[8,1], index: 6, kind: input, shape index: {}]   ;;  %s792_s9 = inlined_call_operand.vmem [shape: f32[8,1], index: 9, kind: input, shape index: {}]   ;;  %s793_s5 = inlined_call_operand.vmem [shape: f32[8,8], index: 5, kind: input, shape index: {}]   ;;  %s794_s7 = inlined_call_operand.vmem [shape: f32[8,8], index: 7, kind: input, shape index: {}]   ;;  %s795_s8 = inlined_call_operand.vmem [shape: f32[8,8], index: 8, kind: input, shape index: {}]   ;;  %s796_s10 = inlined_call_operand.vmem [shape: f32[8,2], index: 10, kind: output, shape index: {}]  }
   0x1   :  { %v35_v0 = vld [vmem:[%s786_s0] sm:$0xff]  ;;  %v36_v2 = vld [vmem:[%s786_s0 + $0x8] sm:$0xff]  ;;  %606 = vmatprep.subr.mxu0 %v653_v6  ;;  %611 = vmatprep.subr.mxu1 %v653_v6  ;;  %v655_v7 = vmov 0   ;;  %vm62_vm3 = vcmask 7168   ;;  %vm76_vm4 = vcmask 64512   ;;  %vm150_vm5 = vcmask 15360  }
   0x2   :  { %37 = vadd.xlane.f32.xlu0 %v35_v0  ;;  %v42_v1 = vsel %vm41_vm0, %v35_v0, -inf  ;;  %v46_v3 = vsel %vm45_vm1, %v35_v0, -inf  ;;  %v54_v4 = vsel %vm41_vm0, %v36_v2, -inf  ;;  %v57_v5 = vsel %vm45_vm1, %v36_v2, -inf  ;;  %608 = vmatprep.mubr.msk.f32.mxu0 %vm654_vm2, %v653_v6  ;;  %v66_v8 = vld [vmem:[%s787_s2] sm:$0xff] }
   0x3   :  { %43 = vmax.xlane.f32.xlu1 %v42_v1  ;;  %613 = vmatprep.mubr.msk.f32.mxu1 %vm654_vm2, %v653_v6  ;;  %v65_v15 = vld [vmem:[%s788_s1] sm:$0xff] }
   0x4   :  { %639 = vset.pattern.permute.xlu0 %v655_v7  ;;  %640 = vset.pattern.permute.xlu1 %v655_v7  ;;  %v67_v33 = vld [vmem:[%s789_s3] sm:$0xff] }
   0x5   :  { %v68_v44 = vld [vmem:[%s790_s4] sm:$0xff] }
   0x6   :  { %51 = vadd.xlane.f32.xlu0 %v36_v2  ;;  %v70_v45 = vld [vmem:[%s791_s6] sm:$0xff] }
   0x7   :  { %47 = vmax.xlane.f32.xlu1 %v46_v3  ;;  %v574_v46 = vld [vmem:[%s792_s9] sm:$0xff] }
   0x8   :  { %v69_v61 = vld [vmem:[%s793_s5] sm:$0xff] }
   0xa   :  { %55 = vmax.xlane.f32.xlu0 %v54_v4 }
   0xb   :  { %58 = vmax.xlane.f32.xlu1 %v57_v5 }
  0x20   :  { %73 = vperm.xlu0 %639, %v66_v8  }
  0x8b   :  { %v38_v9 = vpop.xlane.xlu0 %37 }
  0x8c   :  { %v44_v10 = vpop.xlane.xlu1 %43  ;;  %v40_v12 = vmul.f32 0.0078125, %v38_v9 }
  0x8f   :  { %v52_v11 = vpop.xlane.xlu0 %51 }
  0x90   :  { %v53_v13 = vmul.f32 0.0078125, %v52_v11  ;;  %v48_v14 = vpop.xlane.xlu1 %47 }
  0x91   :  { %v49_v17 = vadd.f32 %v48_v14, %v44_v10 }
  0x92   :  { %v730_v16 = vsel %vm62_vm3, %v40_v12, %v53_v13 }
  0x93   :  { %607 = vmatpush3.msra.mxu0 %v730_v16  ;;  %v56_v18 = vpop.xlane.xlu0 %55  ;;  %v50_v21 = vmul.f32 0.5, %v49_v17 }
  0x94   :  { %609 = vmatmul.mubr.msk.f32.vlgmr.msra.gmra.mxu0 %vm76_vm4, %v65_v15  ;;  %v59_v19 = vpop.xlane.xlu1 %58  ;;  %616 = vmatprep.subr.mxu0 %v653_v6 }
  0x95   :  { %v60_v20 = vadd.f32 %v59_v19, %v56_v18  ;;  %618 = vmatprep.mubr.msk.f32.mxu0 %vm654_vm2, %v653_v6  ;;  %v426_v18 = vld [vmem:[%s794_s7] sm:$0xff] }
  0x97   :  { %v61_v22 = vmul.f32 0.5, %v60_v20 }
  0x99   :  { %v738_v23 = vsel %vm62_vm3, %v50_v21, %v61_v22  ;;  %v427_v21 = vld [vmem:[%s795_s8] sm:$0xff] }
  0x9a   :  { %617 = vmatpush3.msra.mxu0 %v738_v23 }
  0x9b   :  { %619 = vmatmul.mubr.msk.f32.vlgmr.msra.gmra.mxu0 %vm76_vm4, %v65_v15  ;;  %626 = vmatprep.subr.mxu0 %v653_v6  ;;  %v74_v24 = vpop.permute.xlu0 %73 }
  0x9c   :  { %628 = vmatprep.mubr.msk.f32.mxu0 %vm654_vm2, %v653_v6 }
 0x154   :  { %v146_v25 = vpop.f32.mrf.mxu0 }
 0x155   :  { %v147_v26 = vadd.f32 %v146_v25, %v74_v24 }
 0x156   :  { %v610_v27 = vpop.f32.mrf.mxu0 }
 0x157   :  { %v151_v28 = vsel %vm150_vm5, %v147_v26, 0.0 }
 0x158   :  { %152 = vadd.xlane.f32.xlu1 %v151_v28 }
 0x15b   :  { %v329_v29 = vpop.f32.mrf.mxu0 }
 0x15c   :  { %v330_v30 = vadd.f32 %v329_v29, %v74_v24 }
 0x15d   :  { %v620_v31 = vpop.f32.mrf.mxu0 }
 0x15e   :  { %v333_v32 = vsel %vm150_vm5, %v330_v30, 0.0 }
 0x15f   :  { %334 = vadd.xlane.f32.xlu1 %v333_v32 }
 0x170   :  { %167 = vperm.xlu1 %640, %v67_v33  }
 0x1e1   :  { %v153_v34 = vpop.xlane.xlu1 %152 }
 0x1e2   :  { %v155_v35 = vmul.f32 0.5, %v153_v34 }
 0x1e4   :  { %v156_v36 = vsub.f32 %v147_v26, %v155_v35 }
 0x1e6   :  { %v157_v37 = vmul.f32 %v156_v36, %v156_v36 }
 0x1e8   :  { %v335_v38 = vpop.xlane.xlu1 %334  ;;  %v158_v39 = vsel %vm150_vm5, %v157_v37, 0.0 }
 0x1e9   :  { %v336_v40 = vmul.f32 0.5, %v335_v38  ;;  %159 = vadd.xlane.f32.xlu1 %v158_v39 }
 0x1eb   :  { %v337_v41 = vsub.f32 %v330_v30, %v336_v40 }
 0x1ec   :  { %v168_v47 = vpop.permute.xlu1 %167 }
 0x1ed   :  { %v338_v42 = vmul.f32 %v337_v41, %v337_v41 }
 0x1ef   :  { %v339_v43 = vsel %vm150_vm5, %v338_v42, 0.0 }
 0x1f0   :  { %340 = vadd.xlane.f32.xlu1 %v339_v43 }
 0x201   :  { %173 = vperm.xlu1 %640, %v68_v44  }
 0x205   :  { %180 = vperm.xlu1 %640, %v70_v45  }
 0x209   :  { %577 = vperm.xlu1 %640, %v574_v46  }
 0x272   :  { %v160_v48 = vpop.xlane.xlu1 %159 }
 0x273   :  { %v161_v49 = vmul.f32 0.5, %v160_v48 }
 0x275   :  { %v162_v50 = vadd.f32 1e-05, %v161_v49 }
 0x277   :  { %641 = vrsqrt.f32 %v162_v50 }
 0x279   :  { %v341_v51 = vpop.xlane.xlu1 %340 }
 0x27a   :  { %v342_v52 = vmul.f32 0.5, %v341_v51 }
 0x27c   :  { %v343_v53 = vadd.f32 1e-05, %v342_v52 }
 0x27d   :  { %v174_v57 = vpop.permute.xlu1 %173 }
 0x27e   :  { %643 = vrsqrt.f32 %v343_v53 }
 0x281   :  { %v181_v2 = vpop.permute.xlu1 %180 }
 0x284   :  { %v642_v54 = vpop.eup %641 }
 0x285   :  { %v164_v55 = vmul.f32 %v642_v54, %v156_v36  ;;  %v578_v26 = vpop.permute.xlu1 %577 }
 0x287   :  { %v170_v56 = vmul.f32 %v168_v47, %v164_v55 }
 0x289   :  { %v176_v58 = vadd.f32 %v174_v57, %v170_v56 }
 0x28b   :  { %v644_v59 = vpop.eup %643  ;;  %v177_v60 = vmax.f32 %v176_v58, 0.0 }
 0x28c   :  { %v345_v62 = vmul.f32 %v644_v59, %v337_v41 }
 0x28d   :  { %612 = vmatpush3.msra.mxu1 %v177_v60 }
 0x28e   :  { %v346_v63 = vmul.f32 %v345_v62, %v168_v47  ;;  %614 = vmatmul.mubr.msk.f32.vlgmr.msra.gmra.mxu1 %vm76_vm4, %v69_v61  ;;  %621 = vmatprep.subr.mxu1 %v653_v6 }
 0x28f   :  { %623 = vmatprep.mubr.msk.f32.mxu1 %vm654_vm2, %v653_v6 }
 0x290   :  { %v347_v0 = vadd.f32 %v346_v63, %v174_v57 }
 0x292   :  { %v348_v1 = vmax.f32 %v347_v0, 0.0 }
 0x294   :  { %622 = vmatpush3.msra.mxu1 %v348_v1 }
 0x295   :  { %624 = vmatmul.mubr.msk.f32.vlgmr.msra.gmra.mxu1 %vm76_vm4, %v69_v61  ;;  %631 = vmatprep.subr.mxu1 %v653_v6 }
 0x296   :  { %633 = vmatprep.mubr.msk.f32.mxu1 %vm654_vm2, %v653_v6 }
 0x34e   :  { %v252_v3 = vpop.f32.mrf.mxu1 }
 0x34f   :  { %v253_v4 = vadd.f32 %v252_v3, %v181_v2 }
 0x350   :  { %v615_v5 = vpop.f32.mrf.mxu1 }
 0x351   :  { %v588_v7 = vmul.f32 -1.442695, %v253_v4 }
 0x353   :  { %645 = vpow2.f32 %v588_v7 }
 0x355   :  { %v415_v8 = vpop.f32.mrf.mxu1 }
 0x356   :  { %v416_v9 = vadd.f32 %v415_v8, %v181_v2 }
 0x357   :  { %v625_v10 = vpop.f32.mrf.mxu1 }
 0x358   :  { %v591_v11 = vmul.f32 -1.442695, %v416_v9 }
 0x35a   :  { %647 = vpow2.f32 %v591_v11 }
 0x360   :  { %v646_v12 = vpop.eup %645 }
 0x361   :  { %v259_v13 = vadd.f32 1.0, %v646_v12 }
 0x363   :  { %649 = vrcp.f32 %v259_v13 }
 0x367   :  { %v648_v14 = vpop.eup %647 }
 0x368   :  { %v422_v15 = vadd.f32 1.0, %v648_v14 }
 0x36a   :  { %651 = vrcp.f32 %v422_v15 }
 0x370   :  { %v650_v17 = vpop.eup %649 }
 0x371   :  { %v262_v6 = vmul.f32 %v650_v17, %v730_v16 }
 0x373   :  { %632 = vmatpush3.msra.mxu1 %v262_v6 }
 0x374   :  { %634 = vmatmul.mubr.msk.f32.vlgmr.msra.gmra.mxu1 %vm76_vm4, %v426_v18 }
 0x377   :  { %v652_v19 = vpop.eup %651 }
 0x378   :  { %v425_v20 = vmul.f32 %v652_v19, %v738_v23 }
 0x37a   :  { %627 = vmatpush3.msra.mxu0 %v425_v20 }
 0x37b   :  { %629 = vmatmul.mubr.msk.f32.vlgmr.msra.gmra.mxu0 %vm76_vm4, %v427_v21 }
 0x434   :  { %v570_v22 = vpop.f32.mrf.mxu1 }
 0x436   :  { %v635_v24 = vpop.f32.mrf.mxu1 }
 0x43b   :  { %v497_v16 = vpop.f32.mrf.mxu0 }
 0x43c   :  { %v571_v25 = vadd.f32 %v570_v22, %v497_v16 }
 0x43d   :  { %v630_v27 = vpop.f32.mrf.mxu0 }
 0x43e   :  { %v580_v28 = vadd.f32 %v578_v26, %v571_v25 }
 0x440   :  { %581 = vst.msk [vmem:[%s796_s10] sm:$0xff] %vm150_vm5, %v580_v28 }

// kernel: basic_block2_forward.19
= control target key start
LH: loop header
LB: loop body
LE: loop exit
PB: predicated region body
PF: predicated region fallthrough
CT: control target
= control target key end

     0   :  { %s576_s12 = smov 0   ;;  %s578_s13 = smov 0   ;;  %s668_s0 = inlined_call_operand.vmem [shape: f32[16,256], index: 0, kind: input, shape index: {}]   ;;  %s669_s1 = inlined_call_operand.vmem [shape: f32[16,256], index: 1, kind: input, shape index: {}]   ;;  %s670_s2 = inlined_call_operand.vmem [shape: f32[16,2], index: 2, kind: input, shape index: {}]   ;;  %s671_s3 = inlined_call_operand.vmem [shape: f32[16,256], index: 3, kind: output, shape index: {}]  }
   0x1   :  { %s580_s14 = smov 0   ;;  %s582_s15 = smov 0  }
   0x2   :  { %s584_s16 = smov 0  }
   0x3 LB: > { %s25_s17 = sadd.s32 1, %s549_s15  ;;  %s458_s18 = sadd.s32 4294967295, %s553_s16   ;;  %s553_s16 = sphi %s584_s16, %s13_s16   ;;  %s549_s15 = sphi %s582_s15, %s677_s15   ;;  %s545_s14 = sphi %s580_s14, %s676_s14   ;;  %s541_s13 = sphi %s578_s13, %s675_s13   ;;  %s537_s12 = sphi %s576_s12, %s674_s12  }
   0x4   : > { %p27_p0 = scmp.ge.s32.totalorder %s25_s17, 2  ;;  %p41_p1 = scmp.ne.s32.totalorder %s541_s13, %s537_s12 }
   0x5   : > { %p42_p2 = scmp.eq.s32.totalorder %s553_s16, 0  ;;  %p122_p4 = scmp.eq.s32.totalorder %s458_s18, 1 }
   0x6   : > { %s679_s17 = smov (%p27_p0, %s25_s17), 0  ;;  %s34_s21 = sadd.s32 1, %s541_s13 }
   0x7   : > { %p608_p3 = por %p42_p2, %p41_p1  ;;  %s31_s20 = ssub.s32 %s549_s15, %s679_s17 }
   0x8   : > { %p32_p5 = scmp.eq.s32.totalorder %s31_s20, 0  ;;  %p615_p6 = por %p122_p4, %p41_p1 }
   0x9   : > { %p461_p7 = scmp.ge.s32.totalorder %s553_s16, 2 }
   0xa   : > { %s620_s23 = scalar_select %p32_p5, %s541_s13, %s34_s21  }
   0xb   : > { %147 = sbr.rel (%p461_p7) target bundleno = 26 (0x1a), region = 20 }
  0x10   : > { %150 = sbr.rel (!%p608_p3) target bundleno = 21 (0x15), region = 24  ;;  %s152_s24 = sand.u32 (%p608_p3), 1, %s541_s13  }
  0x11   : > { %s463_s25 = sshll.u32 (%p608_p3), %s549_s15, 3  ;;  %s462_s26 = sshll.u32 (%p608_p3), %s152_s24, 4 }
  0x12   : > { %s157_s29 = scalar_lea.vmem (%p608_p3), %s668_s0, %s463_s25  ;;  %s154_s30 = scalar_lea.vmem (%p608_p3), [#allocation2], %s462_s26 }
  0x13   : > { %v188_v0 = vld [vmem:[%s157_s29] sm:$0xff] (%p608_p3)  ;;  %v190_v1 = vld [vmem:[%s157_s29 + $0x10] sm:$0xff] (%p608_p3) }
  0x14   : > { %189 = vst [vmem:[%s154_s30] sm:$0xff] (%p608_p3), %v188_v0  ;;  %191 = vst [vmem:[%s154_s30 + $0x8] sm:$0xff] (%p608_p3), %v190_v1 }
  0x15 PF: > { %197 = sbr.rel (!%p608_p3) target bundleno = 26 (0x1a), region = 62  ;;  %s199_s4 = sand.u32 (%p608_p3), 1, %s541_s13  }
  0x16   : > { %s465_s5 = sshll.u32 (%p608_p3), %s549_s15, 3  ;;  %s464_s6 = sshll.u32 (%p608_p3), %s199_s4, 4 }
  0x17   : > { %s204_s9 = scalar_lea.vmem (%p608_p3), %s669_s1, %s465_s5  ;;  %s201_s10 = scalar_lea.vmem (%p608_p3), [#allocation3], %s464_s6 }
  0x18   : > { %v235_v2 = vld [vmem:[%s204_s9] sm:$0xff] (%p608_p3)  ;;  %v237_v3 = vld [vmem:[%s204_s9 + $0x10] sm:$0xff] (%p608_p3) }
  0x19   : > { %236 = vst [vmem:[%s201_s10] sm:$0xff] (%p608_p3), %v235_v2  ;;  %238 = vst [vmem:[%s201_s10 + $0x8] sm:$0xff] (%p608_p3), %v237_v3 }
  0x1a PF: > { %p466_p8 = scmp.ge.s32.totalorder %s553_s16, 1  ;;  %p243_p9 = scmp.lt.s32.totalorder %s553_s16, 3 }
  0x1c   : > { %p244_p10 = pnand %p466_p8, %p243_p9 }
  0x1d   : > { %s250_s21 = sand.u32 (!%p244_p10), 1, %s537_s12  }
  0x1e   : > { %247 = sbr.rel (%p244_p10) target bundleno = 201 (0xc9), region = 100  ;;  %s467_s24 = sshll.u32 (!%p244_p10), %s250_s21, 4 }
  0x1f   : > { %s252_s25 = scalar_lea.vmem (!%p244_p10), [#allocation2], %s467_s24  ;;  %s259_s26 = scalar_lea.vmem (!%p244_p10), [#allocation3], %s467_s24 }
  0x20   : > { %s282_s12 = scalar_lea.vmem (!%p244_p10), [#allocation4], %s467_s24 }
  0x23   : > { %v288_v4 = vlaneseq  ;;  %v290_v5 = vstv %s545_s14  ;;  %v286_v6 = vld [vmem:[%s670_s2] sm:$0xff]  ;;  %v287_v8 = vld [vmem:[%s670_s2 + $0x8] sm:$0xff]  ;;  %vm294_vm0 = vcmask 15360   ;;  %v555_v16 = vmov 0.0   ;;  %s471_s27 = sshll.u32 (%p615_p6), %s545_s14, 3 }
  0x24   : > { %v301_v13 = vld [vmem:[%s252_s25] sm:$0xff]  ;;  %v302_v15 = vld [vmem:[%s252_s25 + $0x8] sm:$0xff]  ;;  %s334_s30 = scalar_lea.vmem (%p615_p6), %s671_s3, %s471_s27 }
  0x25   : > { %v289_v7 = vand.u32 127, %v288_v4  ;;  %vm313_vm2 = vcmp.lt.f32.partialorder %v301_v13, 0.0  ;;  %v305_v14 = vand.u32 2147483647, %v301_v13  ;;  %vm311_vm3 = vcmp.gt.f32.partialorder %v301_v13, 0.0  ;;  %v303_v24 = vld [vmem:[%s259_s26] sm:$0xff] }
  0x26   : > { %v315_v17 = vsel %vm313_vm2, -1.0, %v555_v16  ;;  %vm314_vm4 = vcmp.lt.f32.partialorder %v302_v15, 0.0  ;;  %v306_v20 = vand.u32 2147483647, %v302_v15  ;;  %vm312_vm5 = vcmp.gt.f32.partialorder %v302_v15, 0.0  ;;  %v304_v31 = vld [vmem:[%s259_s26 + $0x8] sm:$0xff] }
  0x27   : > { %vm291_vm1 = vcmp.eq.s32.totalorder %v289_v7, %v290_v5  ;;  %v317_v21 = vsel %vm311_vm3, 1.0, %v315_v17  ;;  %v316_v23 = vsel %vm314_vm4, -1.0, %v555_v16 }
  0x28   : > { %v292_v9 = vsel %vm291_vm1, %v286_v6, 0.0  ;;  %v293_v10 = vsel %vm291_vm1, %v287_v8, 0.0  ;;  %v318_v28 = vsel %vm312_vm5, 1.0, %v316_v23 }
  0x29   : > { %v295_v11 = vsel %vm294_vm0, %v292_v9, 0.0  ;;  %v298_v12 = vsel %vm294_vm0, %v293_v10, 0.0 }
  0x2a   : > { %296 = vadd.xlane.f32.xlu0 %v295_v11 }
  0x2e   : > { %299 = vadd.xlane.f32.xlu0 %v298_v12 }
  0xb3   : > { %v297_v18 = vpop.xlane.xlu0 %296 }
  0xb4   : > { %v307_v19 = vsub.f32 %v305_v14, %v297_v18 }
  0xb6   : > { %v309_v22 = vmax.f32 %v307_v19, 0.0 }
  0xb7   : > { %v300_v25 = vpop.xlane.xlu0 %299 }
  0xb8   : > { %v319_v26 = vmul.f32 %v317_v21, %v309_v22  ;;  %v308_v27 = vsub.f32 %v306_v20, %v300_v25 }
  0xba   : > { %v321_v29 = vadd.f32 %v319_v26, %v303_v24  ;;  %v310_v30 = vmax.f32 %v308_v27, 0.0 }
  0xbc   : > { %323 = vst [vmem:[%s282_s12] sm:$0xff] %v321_v29  ;;  %v320_v32 = vmul.f32 %v318_v28, %v310_v30  ;;  %331 = sbr.rel (!%p615_p6) target bundleno = 201 (0xc9), region = 112 }
  0xbe   : > { %v322_v33 = vadd.f32 %v320_v32, %v304_v31 }
  0xc0   : > { %324 = vst [vmem:[%s282_s12 + $0x8] sm:$0xff] %v322_v33 }
  0xc3   : > { %v365_v34 = vld [vmem:[%s282_s12] sm:$0xff] }
  0xc4   : > { %366 = vst [vmem:[%s334_s30] sm:$0xff] %v365_v34 }
  0xc7   : > { %v367_v35 = vld [vmem:[%s282_s12 + $0x8] sm:$0xff] }
  0xc8   : > { %368 = vst [vmem:[%s334_s30 + $0x10] sm:$0xff] %v367_v35 }
  0xc9 PF: > { %s13_s16 = sadd.s32 1, %s553_s16   ;;  %s674_s12 = smov %s541_s13 }
  0xca   : > { %p10_p11 = scmp.ge.s32.totalorder %s13_s16, 4   ;;  %s675_s13 = smov %s620_s23 }
  0xcb   : > { %s676_s14 = smov %s549_s15  ;;  %s677_s15 = smov %s679_s17 }
  0xcc   :  { %12 = sbr.rel (!%p10_p11) target bundleno = 3 (0x3), region = 189 }

// kernel: basic_block2_forward.15
= control target key start
LH: loop header
LB: loop body
LE: loop exit
PB: predicated region body
PF: predicated region fallthrough
CT: control target
= control target key end

     0   :  { %v271_v2 = vmov 0.0   ;;  %s272_s19 = smov 127   ;;  %s273_s20 = smov 1   ;;  %v19_v3 = vlaneseq  ;;  %vm61_vm0 = vcmask 1039360   ;;  %vm52_vm3 = vcmask 7168   ;;  %s338_s0 = inlined_call_operand.vmem [shape: f32[8,256], index: 0, kind: input, shape index: {}]   ;;  %s339_s1 = inlined_call_operand.vmem [shape: f32[16,24], index: 1, kind: input, shape index: {}]   ;;  %s340_s2 = inlined_call_operand.vmem [shape: f32[16,1], index: 2, kind: input, shape index: {}]   ;;  %s341_s3 = inlined_call_operand.vmem [shape: f32[16,1], index: 3, kind: input, shape index: {}]   ;;  %s342_s4 = inlined_call_operand.vmem [shape: f32[16,256], index: 4, kind: output, shape index: {}]  }
   0x1   :  { %v18_v0 = vld [vmem:[%s338_s0 + $0x8] sm:$0xff]  ;;  %v17_v1 = vld [vmem:[%s338_s0] sm:$0xff]  ;;  %155 = vmatprep.mubr.f32.mxu0 %v271_v2  ;;  %161 = vmatprep.mubr.f32.mxu1 %v271_v2  ;;  %vm84_vm6 = vcmask 195584   ;;  %v274_v23 = vmov 0  }
   0x2   :  { %59 = vrot.lane.b32.xlu0 %v18_v0, %s272_s19  ;;  %48 = vrot.lane.b32.xlu1 %v17_v1, %s273_s20  ;;  %v20_v4 = vand.u32 127, %v19_v3  ;;  %v82_v14 = vld [vmem:[%s339_s1] sm:$0xff]  ;;  %v83_v15 = vld [vmem:[%s339_s1 + $0x8] sm:$0xff] }
   0x3   :  { %265 = vset.pattern.permute.xlu1 %v274_v23  ;;  %v201_v24 = vld [vmem:[%s340_s2] sm:$0xff]  ;;  %266 = vset.pattern.permute.xlu0 %v274_v23  ;;  %v218_v26 = vld [vmem:[%s341_s3 + $0x8] sm:$0xff] }
   0x4   :  { %v21_v5 = vadd.s32 128, %v20_v4  ;;  %vm252_vm2 = vcmp.ne.s32.totalorder %v20_v4, 127  ;;  %vm254_vm5 = vcmp.ne.s32.totalorder %v20_v4, 0  ;;  %v217_v25 = vld [vmem:[%s341_s3] sm:$0xff]  ;;  %v202_v41 = vld [vmem:[%s340_s2 + $0x8] sm:$0xff] }
   0x6   :  { %50 = vrot.lane.b32.xlu1 %v18_v0, %s273_s20  ;;  %57 = vrot.lane.b32.xlu0 %v17_v1, %s272_s19  ;;  %v33_v6 = vand.u32 127, %v21_v5 }
   0x8   :  { %vm251_vm1 = vcmp.ne.s32.totalorder %v33_v6, 127  ;;  %vm253_vm4 = vcmp.ne.s32.totalorder %v33_v6, 0 }
  0x74   :  { %v60_v7 = vpop.permute.xlu0 %59  ;;  %v49_v8 = vpop.permute.xlu1 %48 }
  0x75   :  { %v65_v9 = vsel %vm61_vm0, %v60_v7, 0.0  ;;  %v56_v16 = vsel %vm52_vm3, 0.0, %v49_v8 }
  0x76   :  { %242 = vmatprep.subr.msk.mxu0 %vm251_vm1, %v65_v9  ;;  %255 = vmatprep.subr.msk.mxu1 %vm251_vm1, %v65_v9 }
  0x78   :  { %v58_v10 = vpop.permute.xlu0 %57  ;;  %v51_v11 = vpop.permute.xlu1 %50 }
  0x79   :  { %v62_v12 = vsel %vm61_vm0, %v58_v10, %v60_v7  ;;  %v53_v13 = vsel %vm52_vm3, %v49_v8, %v51_v11 }
  0x7a   :  { %244 = vmatpush1.msk.msra.mxu0 %vm252_vm2, %v62_v12  ;;  %258 = vmatpush1.msk.msra.mxu1 %vm252_vm2, %v62_v12 }
  0x7b   :  { %119 = vmatprep.subr.mxu0 %v18_v0  ;;  %256 = vmatprep.subr.mxu1 %v18_v0 }
  0x7c   :  { %120 = vmatpush1.msra.mxu0 %v17_v1  ;;  %259 = vmatpush1.msra.mxu1 %v17_v1 }
  0x7d   :  { %246 = vmatprep.subr.msk.mxu0 %vm253_vm4, %v53_v13  ;;  %257 = vmatprep.subr.msk.mxu1 %vm253_vm4, %v53_v13 }
  0x7e   :  { %248 = vmatpush1.msk.msra.mxu0 %vm254_vm5, %v56_v16  ;;  %260 = vmatpush1.msk.msra.mxu1 %vm254_vm5, %v56_v16 }
  0x7f   :  { %249 = vmatmul.mubr.msk.f32.vlgmr.msra.gmra.mxu0 %vm84_vm6, %v82_v14  ;;  %250 = vmatmul.mubr.msk.f32.vlgmr.msra.gmra.mxu1 %vm84_vm6, %v83_v15 }
 0x13f   :  { %v157_v17 = vpop.f32.mrf.mxu0  ;;  %v163_v18 = vpop.f32.mrf.mxu1 }
 0x141   :  { %v159_v19 = vpop.f32.mrf.mxu0  ;;  %v165_v20 = vpop.f32.mrf.mxu1 }
 0x142   :  { %v168_v21 = vadd.f32 %v159_v19, %v157_v17  ;;  %v171_v22 = vadd.f32 %v165_v20, %v163_v18 }
 0x144   :  { %172 = vadd.xlane.f32.xlu1 %v171_v22  ;;  %169 = vadd.xlane.f32.xlu0 %v168_v21 }
 0x155   :  { %205 = vperm.xlu1 %265, %v201_v24  }
 0x159   :  { %221 = vperm.xlu1 %265, %v217_v25  }
 0x15d   :  { %226 = vperm.xlu1 %265, %v218_v26  }
 0x1cd   :  { %v173_v27 = vpop.xlane.xlu1 %172  ;;  %v170_v28 = vpop.xlane.xlu0 %169 }
 0x1ce   :  { %v176_v29 = vmul.f32 0.00390625, %v173_v27  ;;  %v175_v30 = vmul.f32 0.00390625, %v170_v28 }
 0x1d0   :  { %v179_v31 = vsub.f32 %v163_v18, %v176_v29  ;;  %v180_v32 = vsub.f32 %v165_v20, %v176_v29  ;;  %v177_v33 = vsub.f32 %v157_v17, %v175_v30  ;;  %v178_v34 = vsub.f32 %v159_v19, %v175_v30 }
 0x1d1   :  { %v206_v48 = vpop.permute.xlu1 %205 }
 0x1d2   :  { %v181_v35 = vmul.f32 %v177_v33, %v177_v33  ;;  %v182_v36 = vmul.f32 %v178_v34, %v178_v34  ;;  %v183_v38 = vmul.f32 %v179_v31, %v179_v31  ;;  %v184_v39 = vmul.f32 %v180_v32, %v180_v32 }
 0x1d4   :  { %v185_v37 = vadd.f32 %v182_v36, %v181_v35  ;;  %v188_v40 = vadd.f32 %v184_v39, %v183_v38 }
 0x1d5   :  { %v222_v52 = vpop.permute.xlu1 %221 }
 0x1d6   :  { %186 = vadd.xlane.f32.xlu0 %v185_v37 }
 0x1d9   :  { %v227_v63 = vpop.permute.xlu1 %226 }
 0x1da   :  { %189 = vadd.xlane.f32.xlu0 %v188_v40 }
 0x1f0   :  { %210 = vperm.xlu0 %266, %v202_v41  }
 0x25f   :  { %v187_v42 = vpop.xlane.xlu0 %186 }
 0x260   :  { %v191_v43 = vmul.f32 0.00390625, %v187_v42 }
 0x262   :  { %v193_v44 = vadd.f32 1e-05, %v191_v43 }
 0x263   :  { %v190_v45 = vpop.xlane.xlu0 %189 }
 0x264   :  { %267 = vrsqrt.f32 %v193_v44  ;;  %v192_v46 = vmul.f32 0.00390625, %v190_v45 }
 0x266   :  { %v194_v47 = vadd.f32 1e-05, %v192_v46 }
 0x268   :  { %269 = vrsqrt.f32 %v194_v47 }
 0x26b   :  { %v211_v56 = vpop.permute.xlu0 %210 }
 0x271   :  { %v268_v49 = vpop.eup %267 }
 0x272   :  { %v197_v50 = vmul.f32 %v268_v49, %v177_v33  ;;  %v198_v51 = vmul.f32 %v268_v49, %v178_v34 }
 0x274   :  { %v213_v53 = vmul.f32 %v206_v48, %v197_v50  ;;  %v214_v54 = vmul.f32 %v206_v48, %v198_v51 }
 0x275   :  { %v270_v55 = vpop.eup %269 }
 0x276   :  { %v229_v57 = vadd.f32 %v222_v52, %v213_v53  ;;  %v230_v58 = vadd.f32 %v222_v52, %v214_v54  ;;  %v199_v59 = vmul.f32 %v270_v55, %v179_v31  ;;  %v200_v60 = vmul.f32 %v270_v55, %v180_v32 }
 0x278   :  { %233 = vst [vmem:[%s342_s4] sm:$0xff] %v229_v57  ;;  %234 = vst [vmem:[%s342_s4 + $0x8] sm:$0xff] %v230_v58  ;;  %v215_v61 = vmul.f32 %v211_v56, %v199_v59  ;;  %v216_v62 = vmul.f32 %v211_v56, %v200_v60 }
 0x27a   :  { %v231_v0 = vadd.f32 %v227_v63, %v215_v61  ;;  %v232_v1 = vadd.f32 %v227_v63, %v216_v62 }
 0x27c   :  { %235 = vst [vmem:[%s342_s4 + $0x10] sm:$0xff] %v231_v0  ;;  %236 = vst [vmem:[%s342_s4 + $0x18] sm:$0xff] %v232_v1 }

// kernel: basic_block2_forward.16
= control target key start
LH: loop header
LB: loop body
LE: loop exit
PB: predicated region body
PF: predicated region fallthrough
CT: control target
= control target key end

     0   :  { %s313_s19 = smov 127   ;;  %v314_v4 = vmov 0.0   ;;  %s315_s24 = smov 1   ;;  %v21_v5 = vlaneseq  ;;  %vm77_vm0 = vcmask 1039360   ;;  %vm60_vm3 = vcmask 7168   ;;  %s404_s0 = inlined_call_operand.vmem [shape: f32[16,256], index: 0, kind: input, shape index: {}]   ;;  %s405_s1 = inlined_call_operand.vmem [shape: f32[16,48], index: 1, kind: input, shape index: {}]   ;;  %s406_s2 = inlined_call_operand.vmem [shape: f32[16,1], index: 2, kind: input, shape index: {}]   ;;  %s407_s3 = inlined_call_operand.vmem [shape: f32[16,1], index: 3, kind: input, shape index: {}]   ;;  %s408_s4 = inlined_call_operand.vmem [shape: f32[16,256], index: 4, kind: output, shape index: {}]  }
   0x1   :  { %v20_v0 = vld [vmem:[%s404_s0 + $0x18] sm:$0xff]  ;;  %v18_v1 = vld [vmem:[%s404_s0 + $0x8] sm:$0xff]  ;;  %v19_v2 = vld [vmem:[%s404_s0 + $0x10] sm:$0xff]  ;;  %179 = vmatprep.mubr.f32.mxu0 %v314_v4  ;;  %185 = vmatprep.mubr.f32.mxu1 %v314_v4  ;;  %vm108_vm6 = vcmask 392192   ;;  %v316_v34 = vmov 0  }
   0x2   :  { %75 = vrot.lane.b32.xlu0 %v20_v0, %s313_s19  ;;  %71 = vrot.lane.b32.xlu1 %v18_v1, %s313_s19  ;;  %v17_v3 = vld [vmem:[%s404_s0] sm:$0xff]  ;;  %v22_v6 = vand.u32 127, %v21_v5  ;;  %v107_v27 = vld [vmem:[%s405_s1 + $0x8] sm:$0xff] }
   0x3   :  { %v106_v26 = vld [vmem:[%s405_s1] sm:$0xff]  ;;  %307 = vset.pattern.permute.xlu1 %v316_v34  ;;  %308 = vset.pattern.permute.xlu0 %v316_v34  ;;  %v242_v37 = vld [vmem:[%s407_s3 + $0x8] sm:$0xff] }
   0x4   :  { %v23_v7 = vadd.s32 128, %v22_v6  ;;  %vm288_vm2 = vcmp.ne.s32.totalorder %v22_v6, 127  ;;  %vm290_vm5 = vcmp.ne.s32.totalorder %v22_v6, 0  ;;  %v225_v35 = vld [vmem:[%s406_s2] sm:$0xff]  ;;  %v226_v52 = vld [vmem:[%s406_s2 + $0x8] sm:$0xff] }
   0x5   :  { %v241_v36 = vld [vmem:[%s407_s3] sm:$0xff] }
   0x6   :  { %73 = vrot.lane.b32.xlu0 %v19_v2, %s313_s19  ;;  %69 = vrot.lane.b32.xlu1 %v17_v3, %s313_s19  ;;  %v35_v8 = vand.u32 127, %v23_v7 }
   0x8   :  { %vm287_vm1 = vcmp.ne.s32.totalorder %v35_v8, 127  ;;  %vm354_vm4 = vcmp.ne.s32.totalorder %v35_v8, 0 }
   0xa   :  { %56 = vrot.lane.b32.xlu0 %v19_v2, %s315_s24  ;;  %58 = vrot.lane.b32.xlu1 %v20_v0, %s315_s24 }
   0xe   :  { %52 = vrot.lane.b32.xlu0 %v17_v3, %s315_s24  ;;  %54 = vrot.lane.b32.xlu1 %v18_v1, %s315_s24 }
  0x74   :  { %v76_v9 = vpop.permute.xlu0 %75  ;;  %v72_v10 = vpop.permute.xlu1 %71 }
  0x75   :  { %v85_v11 = vsel %vm77_vm0, %v76_v9, 0.0  ;;  %v84_v15 = vsel %vm77_vm0, %v72_v10, 0.0 }
  0x76   :  { %270 = vmatprep.subr.msk.mxu0 %vm287_vm1, %v85_v11  ;;  %291 = vmatprep.subr.msk.mxu1 %vm287_vm1, %v85_v11 }
  0x78   :  { %v74_v12 = vpop.permute.xlu0 %73  ;;  %v70_v13 = vpop.permute.xlu1 %69 }
  0x79   :  { %v79_v14 = vsel %vm77_vm0, %v74_v12, %v76_v9  ;;  %v78_v16 = vsel %vm77_vm0, %v70_v13, %v72_v10 }
  0x7a   :  { %272 = vmatpush1.msk.msra.mxu0 %vm288_vm2, %v79_v14  ;;  %297 = vmatpush1.msk.msra.mxu1 %vm288_vm2, %v79_v14 }
  0x7b   :  { %274 = vmatprep.subr.msk.mxu0 %vm287_vm1, %v84_v15  ;;  %292 = vmatprep.subr.msk.mxu1 %vm287_vm1, %v84_v15 }
  0x7c   :  { %276 = vmatpush1.msk.msra.mxu0 %vm288_vm2, %v78_v16  ;;  %298 = vmatpush1.msk.msra.mxu1 %vm288_vm2, %v78_v16  ;;  %v57_v17 = vpop.permute.xlu0 %56  ;;  %v59_v18 = vpop.permute.xlu1 %58 }
  0x7d   :  { %139 = vmatprep.subr.mxu0 %v20_v0  ;;  %293 = vmatprep.subr.mxu1 %v20_v0  ;;  %v62_v20 = vsel %vm60_vm3, %v57_v17, %v59_v18  ;;  %v68_v23 = vsel %vm60_vm3, 0.0, %v57_v17 }
  0x7e   :  { %140 = vmatpush1.msra.mxu0 %v19_v2  ;;  %299 = vmatpush1.msra.mxu1 %v19_v2 }
  0x7f   :  { %141 = vmatprep.subr.mxu0 %v18_v1  ;;  %294 = vmatprep.subr.mxu1 %v18_v1 }
  0x80   :  { %142 = vmatpush1.msra.mxu0 %v17_v3  ;;  %300 = vmatpush1.msra.mxu1 %v17_v3  ;;  %v53_v21 = vpop.permute.xlu0 %52  ;;  %v55_v22 = vpop.permute.xlu1 %54 }
  0x81   :  { %v67_v24 = vsel %vm60_vm3, 0.0, %v53_v21  ;;  %278 = vmatprep.subr.msk.mxu0 %vm354_vm4, %v62_v20  ;;  %295 = vmatprep.subr.msk.mxu1 %vm354_vm4, %v62_v20  ;;  %v61_v25 = vsel %vm60_vm3, %v53_v21, %v55_v22 }
  0x82   :  { %280 = vmatpush1.msk.msra.mxu0 %vm290_vm5, %v68_v23  ;;  %301 = vmatpush1.msk.msra.mxu1 %vm290_vm5, %v68_v23 }
  0x83   :  { %282 = vmatprep.subr.msk.mxu0 %vm354_vm4, %v61_v25  ;;  %296 = vmatprep.subr.msk.mxu1 %vm354_vm4, %v61_v25 }
  0x84   :  { %284 = vmatpush1.msk.msra.mxu0 %vm290_vm5, %v67_v24  ;;  %302 = vmatpush1.msk.msra.mxu1 %vm290_vm5, %v67_v24 }
  0x85   :  { %285 = vmatmul.mubr.msk.f32.vlgmr.msra.gmra.mxu0 %vm108_vm6, %v106_v26  ;;  %286 = vmatmul.mubr.msk.f32.vlgmr.msra.gmra.mxu1 %vm108_vm6, %v107_v27 }
 0x145   :  { %v181_v28 = vpop.f32.mrf.mxu0  ;;  %v187_v29 = vpop.f32.mrf.mxu1 }
 0x147   :  { %v183_v30 = vpop.f32.mrf.mxu0  ;;  %v189_v31 = vpop.f32.mrf.mxu1 }
 0x148   :  { %v192_v32 = vadd.f32 %v183_v30, %v181_v28  ;;  %v195_v33 = vadd.f32 %v189_v31, %v187_v29 }
 0x14a   :  { %196 = vadd.xlane.f32.xlu1 %v195_v33  ;;  %193 = vadd.xlane.f32.xlu0 %v192_v32 }
 0x15b   :  { %229 = vperm.xlu1 %307, %v225_v35  }
 0x15f   :  { %245 = vperm.xlu1 %307, %v241_v36  }
 0x163   :  { %250 = vperm.xlu1 %307, %v242_v37  }
 0x1d3   :  { %v197_v38 = vpop.xlane.xlu1 %196  ;;  %v194_v39 = vpop.xlane.xlu0 %193 }
 0x1d4   :  { %v200_v40 = vmul.f32 0.00390625, %v197_v38  ;;  %v199_v41 = vmul.f32 0.00390625, %v194_v39 }
 0x1d6   :  { %v203_v42 = vsub.f32 %v187_v29, %v200_v40  ;;  %v204_v43 = vsub.f32 %v189_v31, %v200_v40  ;;  %v201_v44 = vsub.f32 %v181_v28, %v199_v41  ;;  %v202_v45 = vsub.f32 %v183_v30, %v199_v41 }
 0x1d7   :  { %v230_v59 = vpop.permute.xlu1 %229 }
 0x1d8   :  { %v205_v46 = vmul.f32 %v201_v44, %v201_v44  ;;  %v206_v47 = vmul.f32 %v202_v45, %v202_v45  ;;  %v207_v49 = vmul.f32 %v203_v42, %v203_v42  ;;  %v208_v50 = vmul.f32 %v204_v43, %v204_v43 }
 0x1da   :  { %v209_v48 = vadd.f32 %v206_v47, %v205_v46  ;;  %v212_v51 = vadd.f32 %v208_v50, %v207_v49 }
 0x1db   :  { %v246_v63 = vpop.permute.xlu1 %245 }
 0x1dc   :  { %210 = vadd.xlane.f32.xlu0 %v209_v48 }
 0x1df   :  { %v251_v12 = vpop.permute.xlu1 %250 }
 0x1e0   :  { %213 = vadd.xlane.f32.xlu0 %v212_v51 }
 0x1f6   :  { %234 = vperm.xlu0 %308, %v226_v52  }
 0x265   :  { %v211_v53 = vpop.xlane.xlu0 %210 }
 0x266   :  { %v215_v54 = vmul.f32 0.00390625, %v211_v53 }
 0x268   :  { %v217_v55 = vadd.f32 1e-05, %v215_v54 }
 0x269   :  { %v214_v56 = vpop.xlane.xlu0 %213 }
 0x26a   :  { %309 = vrsqrt.f32 %v217_v55  ;;  %v216_v57 = vmul.f32 0.00390625, %v214_v56 }
 0x26c   :  { %v218_v58 = vadd.f32 1e-05, %v216_v57 }
 0x26e   :  { %311 = vrsqrt.f32 %v218_v58 }
 0x271   :  { %v235_v3 = vpop.permute.xlu0 %234 }
 0x277   :  { %v310_v60 = vpop.eup %309 }
 0x278   :  { %v221_v61 = vmul.f32 %v310_v60, %v201_v44  ;;  %v222_v62 = vmul.f32 %v310_v60, %v202_v45 }
 0x27a   :  { %v237_v0 = vmul.f32 %v230_v59, %v221_v61  ;;  %v238_v1 = vmul.f32 %v230_v59, %v222_v62 }
 0x27b   :  { %v312_v2 = vpop.eup %311 }
 0x27c   :  { %v253_v4 = vadd.f32 %v246_v63, %v237_v0  ;;  %v254_v5 = vadd.f32 %v246_v63, %v238_v1  ;;  %v223_v6 = vmul.f32 %v312_v2, %v203_v42  ;;  %v224_v7 = vmul.f32 %v312_v2, %v204_v43 }
 0x27e   :  { %v257_v8 = vmax.f32 %v253_v4, 0.0  ;;  %v258_v9 = vmax.f32 %v254_v5, 0.0  ;;  %v239_v10 = vmul.f32 %v235_v3, %v223_v6  ;;  %v240_v11 = vmul.f32 %v235_v3, %v224_v7 }
 0x280   :  { %261 = vst [vmem:[%s408_s4] sm:$0xff] %v257_v8  ;;  %262 = vst [vmem:[%s408_s4 + $0x8] sm:$0xff] %v258_v9  ;;  %v255_v13 = vadd.f32 %v251_v12, %v239_v10  ;;  %v256_v14 = vadd.f32 %v251_v12, %v240_v11 }
 0x282   :  { %v259_v15 = vmax.f32 %v255_v13, 0.0  ;;  %v260_v16 = vmax.f32 %v256_v14, 0.0 }
 0x284   :  { %263 = vst [vmem:[%s408_s4 + $0x10] sm:$0xff] %v259_v15  ;;  %264 = vst [vmem:[%s408_s4 + $0x18] sm:$0xff] %v260_v16 }

// kernel: basic_block2_forward.18
= control target key start
LH: loop header
LB: loop body
LE: loop exit
PB: predicated region body
PF: predicated region fallthrough
CT: control target
= control target key end

     0   :  { %vm46_vm0 = vcmask 523264   ;;  %vm53_vm1 = vcmask 1048064   ;;  %vm113_vm2 = vcmask 130048   ;;  %v845_v13 = vmov 0   ;;  %s1023_s0 = inlined_call_operand.vmem [shape: f32[16,256], index: 0, kind: input, shape index: {}]   ;;  %s1024_s1 = inlined_call_operand.vmem [shape: f32[16,16], index: 1, kind: input, shape index: {}]   ;;  %s1025_s2 = inlined_call_operand.vmem [shape: f32[16,1], index: 2, kind: input, shape index: {}]   ;;  %s1026_s3 = inlined_call_operand.vmem [shape: f32[16,1], index: 3, kind: input, shape index: {}]   ;;  %s1027_s4 = inlined_call_operand.vmem [shape: f32[16,1], index: 4, kind: input, shape index: {}]   ;;  %s1028_s6 = inlined_call_operand.vmem [shape: f32[16,1], index: 6, kind: input, shape index: {}]   ;;  %s1029_s9 = inlined_call_operand.vmem [shape: f32[16,1], index: 9, kind: input, shape index: {}]   ;;  %s1030_s5 = inlined_call_operand.vmem [shape: f32[16,16], index: 5, kind: input, shape index: {}]   ;;  %s1031_s7 = inlined_call_operand.vmem [shape: f32[16,16], index: 7, kind: input, shape index: {}]   ;;  %s1032_s8 = inlined_call_operand.vmem [shape: f32[16,16], index: 8, kind: input, shape index: {}]   ;;  %s1033_s10 = inlined_call_operand.vmem [shape: f32[16,2], index: 10, kind: output, shape index: {}]  }
   0x1   :  { %v37_v0 = vld [vmem:[%s1023_s0 + $0x10] sm:$0xff]  ;;  %v35_v1 = vld [vmem:[%s1023_s0] sm:$0xff]  ;;  %v38_v2 = vld [vmem:[%s1023_s0 + $0x18] sm:$0xff]  ;;  %819 = vset.pattern.permute.xlu0 %v845_v13  ;;  %820 = vset.pattern.permute.xlu1 %v845_v13  ;;  %vm86_vm3 = vcmask 7168   ;;  %vm195_vm4 = vcmask 15360  }
   0x2   :  { %41 = vadd.xlane.f32.xlu0 %v37_v0  ;;  %39 = vadd.xlane.f32.xlu1 %v35_v1  ;;  %v50_v3 = vsel %vm46_vm0, %v37_v0, -inf  ;;  %v57_v4 = vsel %vm53_vm1, %v37_v0, -inf  ;;  %v36_v5 = vld [vmem:[%s1023_s0 + $0x8] sm:$0xff]  ;;  %v73_v6 = vsel %vm46_vm0, %v38_v2, -inf  ;;  %v79_v7 = vsel %vm53_vm1, %v38_v2, -inf  ;;  %v91_v12 = vld [vmem:[%s1024_s1] sm:$0xff] }
   0x3   :  { %v54_v8 = vsel %vm53_vm1, %v35_v1, -inf  ;;  %v47_v9 = vsel %vm46_vm0, %v35_v1, -inf  ;;  %v76_v10 = vsel %vm53_vm1, %v36_v5, -inf  ;;  %v70_v11 = vsel %vm46_vm0, %v36_v5, -inf  ;;  %780 = vmatprep.mubr.msk.f32.mxu0 %vm113_vm2, %v91_v12  ;;  %v93_v14 = vld [vmem:[%s1025_s2] sm:$0xff]  ;;  %v94_v15 = vld [vmem:[%s1025_s2 + $0x8] sm:$0xff] }
   0x4   :  { %v92_v29 = vld [vmem:[%s1024_s1 + $0x8] sm:$0xff]  ;;  %v97_v60 = vld [vmem:[%s1027_s4] sm:$0xff] }
   0x5   :  { %v96_v59 = vld [vmem:[%s1026_s3 + $0x8] sm:$0xff]  ;;  %v101_v61 = vld [vmem:[%s1028_s6] sm:$0xff] }
   0x6   :  { %66 = vadd.xlane.f32.xlu0 %v38_v2  ;;  %51 = vmax.xlane.f32.xlu1 %v50_v3  ;;  %v95_v62 = vld [vmem:[%s1026_s3] sm:$0xff]  ;;  %v717_v63 = vld [vmem:[%s1029_s9 + $0x8] sm:$0xff] }
   0xa   :  { %58 = vmax.xlane.f32.xlu0 %v57_v4  ;;  %64 = vadd.xlane.f32.xlu1 %v36_v5 }
   0xe   :  { %74 = vmax.xlane.f32.xlu0 %v73_v6  ;;  %80 = vmax.xlane.f32.xlu1 %v79_v7 }
  0x12   :  { %55 = vmax.xlane.f32.xlu1 %v54_v8  ;;  %48 = vmax.xlane.f32.xlu0 %v47_v9 }
  0x16   :  { %77 = vmax.xlane.f32.xlu1 %v76_v10  ;;  %71 = vmax.xlane.f32.xlu0 %v70_v11 }
  0x27   :  { %105 = vperm.xlu1 %820, %v93_v14  }
  0x2c   :  { %110 = vperm.xlu0 %819, %v94_v15  }
  0x8b   :  { %v42_v16 = vpop.xlane.xlu0 %41  ;;  %v40_v17 = vpop.xlane.xlu1 %39 }
  0x8c   :  { %v45_v20 = vmul.f32 0.0078125, %v42_v16  ;;  %v44_v25 = vmul.f32 0.0078125, %v40_v17 }
  0x8f   :  { %v67_v18 = vpop.xlane.xlu0 %66  ;;  %v52_v19 = vpop.xlane.xlu1 %51 }
  0x90   :  { %v69_v21 = vmul.f32 0.0078125, %v67_v18 }
  0x92   :  { %v928_v22 = vsel %vm86_vm3, %v45_v20, %v69_v21  ;;  %v98_v20 = vld [vmem:[%s1027_s4 + $0x8] sm:$0xff] }
  0x93   :  { %776 = vmatprep.subr.mxu0 %v928_v22  ;;  %v59_v23 = vpop.xlane.xlu0 %58  ;;  %v65_v24 = vpop.xlane.xlu1 %64  ;;  %v102_v21 = vld [vmem:[%s1028_s6 + $0x8] sm:$0xff] }
  0x94   :  { %v68_v26 = vmul.f32 0.0078125, %v65_v24  ;;  %777 = vmatpush3.msra.mxu0 %v928_v22  ;;  %v61_v27 = vadd.f32 %v59_v23, %v52_v19  ;;  %v716_v23 = vld [vmem:[%s1029_s9] sm:$0xff] }
  0x95   :  { %v99_v24 = vld [vmem:[%s1030_s5] sm:$0xff] }
  0x96   :  { %v933_v28 = vsel %vm86_vm3, %v44_v25, %v68_v26  ;;  %v63_v33 = vmul.f32 0.5, %v61_v27  ;;  %787 = vmatprep.mubr.msk.f32.mxu1 %vm113_vm2, %v99_v24 }
  0x97   :  { %v75_v30 = vpop.xlane.xlu0 %74  ;;  %778 = vmatprep.subr.mxu0 %v933_v28  ;;  %v81_v31 = vpop.xlane.xlu1 %80 }
  0x98   :  { %v83_v32 = vadd.f32 %v81_v31, %v75_v30  ;;  %779 = vmatpush3.msra.mxu0 %v933_v28 }
  0x99   :  { %781 = vmatmul.mubr.msk.f32.vlgmr.msra.gmra.mxu0 %vm113_vm2, %v92_v29 }
  0x9a   :  { %v85_v34 = vmul.f32 0.5, %v83_v32  ;;  %794 = vmatprep.mubr.msk.f32.mxu0 %vm113_vm2, %v91_v12 }
  0x9b   :  { %v56_v35 = vpop.xlane.xlu1 %55  ;;  %v49_v36 = vpop.xlane.xlu0 %48 }
  0x9c   :  { %v943_v37 = vsel %vm86_vm3, %v63_v33, %v85_v34  ;;  %v60_v38 = vadd.f32 %v56_v35, %v49_v36 }
  0x9d   :  { %790 = vmatprep.subr.mxu0 %v943_v37 }
  0x9e   :  { %791 = vmatpush3.msra.mxu0 %v943_v37  ;;  %v62_v42 = vmul.f32 0.5, %v60_v38 }
  0x9f   :  { %v78_v39 = vpop.xlane.xlu1 %77  ;;  %v72_v40 = vpop.xlane.xlu0 %71 }
  0xa0   :  { %v82_v41 = vadd.f32 %v78_v39, %v72_v40 }
  0xa2   :  { %v84_v43 = vmul.f32 0.5, %v82_v41 }
  0xa3   :  { %v106_v47 = vpop.permute.xlu1 %105 }
  0xa4   :  { %v948_v44 = vsel %vm86_vm3, %v62_v42, %v84_v43 }
  0xa5   :  { %792 = vmatprep.subr.mxu0 %v948_v44 }
  0xa6   :  { %793 = vmatpush3.msra.mxu0 %v948_v44 }
  0xa7   :  { %795 = vmatmul.mubr.msk.f32.vlgmr.msra.gmra.mxu0 %vm113_vm2, %v92_v29  ;;  %v111_v45 = vpop.permute.xlu0 %110 }
 0x159   :  { %v782_v46 = vpop.f32.mrf.mxu0 }
 0x15a   :  { %v192_v48 = vadd.f32 %v782_v46, %v111_v45 }
 0x15b   :  { %v186_v49 = vpop.f32.mrf.mxu0 }
 0x15c   :  { %v187_v50 = vadd.f32 %v186_v49, %v106_v47  ;;  %v199_v51 = vsel %vm195_vm4, %v192_v48, 0.0 }
 0x15d   :  { %200 = vadd.xlane.f32.xlu1 %v199_v51 }
 0x15e   :  { %v196_v52 = vsel %vm195_vm4, %v187_v50, 0.0 }
 0x15f   :  { %197 = vadd.xlane.f32.xlu0 %v196_v52 }
 0x167   :  { %v796_v53 = vpop.f32.mrf.mxu0 }
 0x168   :  { %v426_v54 = vadd.f32 %v796_v53, %v111_v45 }
 0x169   :  { %v420_v55 = vpop.f32.mrf.mxu0 }
 0x16a   :  { %v421_v56 = vadd.f32 %v420_v55, %v106_v47  ;;  %v432_v57 = vsel %vm195_vm4, %v426_v54, 0.0 }
 0x16b   :  { %433 = vadd.xlane.f32.xlu1 %v432_v57 }
 0x16c   :  { %v429_v58 = vsel %vm195_vm4, %v421_v56, 0.0 }
 0x16f   :  { %430 = vadd.xlane.f32.xlu1 %v429_v58 }
 0x175   :  { %230 = vperm.xlu0 %819, %v96_v59  }
 0x179   :  { %237 = vperm.xlu0 %819, %v97_v60  }
 0x17d   :  { %251 = vperm.xlu0 %819, %v101_v61  }
 0x180   :  { %225 = vperm.xlu1 %820, %v95_v62  }
 0x181   :  { %725 = vperm.xlu0 %819, %v717_v63  }
 0x1e6   :  { %v201_v0 = vpop.xlane.xlu1 %200 }
 0x1e7   :  { %v204_v1 = vmul.f32 0.5, %v201_v0 }
 0x1e8   :  { %v198_v2 = vpop.xlane.xlu0 %197 }
 0x1e9   :  { %v206_v3 = vsub.f32 %v192_v48, %v204_v1  ;;  %v203_v4 = vmul.f32 0.5, %v198_v2  ;;  %v550_v1 = vld [vmem:[%s1031_s7] sm:$0xff] }
 0x1ea   :  { %v552_v2 = vld [vmem:[%s1032_s8] sm:$0xff] }
 0x1eb   :  { %v205_v5 = vsub.f32 %v187_v50, %v203_v4  ;;  %v208_v6 = vmul.f32 %v206_v3, %v206_v3  ;;  %808 = vmatprep.mubr.msk.f32.mxu0 %vm113_vm2, %v552_v2 }
 0x1ed   :  { %v212_v7 = vsel %vm195_vm4, %v208_v6, 0.0  ;;  %v207_v8 = vmul.f32 %v205_v5, %v205_v5 }
 0x1ee   :  { %213 = vadd.xlane.f32.xlu1 %v212_v7 }
 0x1ef   :  { %v209_v9 = vsel %vm195_vm4, %v207_v8, 0.0 }
 0x1f0   :  { %v231_v41 = vpop.permute.xlu0 %230 }
 0x1f2   :  { %210 = vadd.xlane.f32.xlu1 %v209_v9 }
 0x1f4   :  { %v434_v10 = vpop.xlane.xlu1 %433  ;;  %v238_v51 = vpop.permute.xlu0 %237 }
 0x1f5   :  { %v436_v11 = vmul.f32 0.5, %v434_v10 }
 0x1f7   :  { %v438_v12 = vsub.f32 %v426_v54, %v436_v11  ;;  %v100_v54 = vld [vmem:[%s1030_s5 + $0x8] sm:$0xff] }
 0x1f8   :  { %v431_v13 = vpop.xlane.xlu1 %430  ;;  %v252_v6 = vpop.permute.xlu0 %251 }
 0x1f9   :  { %v435_v14 = vmul.f32 0.5, %v431_v13  ;;  %v440_v15 = vmul.f32 %v438_v12, %v438_v12 }
 0x1fb   :  { %v437_v16 = vsub.f32 %v421_v56, %v435_v14  ;;  %v444_v17 = vsel %vm195_vm4, %v440_v15, 0.0 }
 0x1fc   :  { %445 = vadd.xlane.f32.xlu1 %v444_v17  ;;  %v226_v25 = vpop.permute.xlu1 %225 }
 0x1fd   :  { %v439_v18 = vmul.f32 %v437_v16, %v437_v16 }
 0x1ff   :  { %v441_v19 = vsel %vm195_vm4, %v439_v18, 0.0 }
 0x200   :  { %442 = vadd.xlane.f32.xlu1 %v441_v19 }
 0x211   :  { %242 = vperm.xlu1 %820, %v98_v20  }
 0x215   :  { %256 = vperm.xlu1 %820, %v102_v21  }
 0x219   :  { %720 = vperm.xlu1 %820, %v716_v23  }
 0x277   :  { %v214_v26 = vpop.xlane.xlu1 %213 }
 0x278   :  { %v216_v27 = vmul.f32 0.5, %v214_v26 }
 0x27a   :  { %v218_v29 = vadd.f32 1e-05, %v216_v27 }
 0x27b   :  { %v211_v30 = vpop.xlane.xlu1 %210 }
 0x27c   :  { %821 = vrsqrt.f32 %v218_v29  ;;  %v215_v31 = vmul.f32 0.5, %v211_v30 }
 0x27e   :  { %v217_v32 = vadd.f32 1e-05, %v215_v31  ;;  %v551_v31 = vld [vmem:[%s1031_s7 + $0x8] sm:$0xff] }
 0x280   :  { %823 = vrsqrt.f32 %v217_v32 }
 0x285   :  { %v446_v33 = vpop.xlane.xlu1 %445 }
 0x286   :  { %v448_v34 = vmul.f32 0.5, %v446_v33 }
 0x288   :  { %v450_v35 = vadd.f32 1e-05, %v448_v34 }
 0x289   :  { %v822_v36 = vpop.eup %821  ;;  %v443_v38 = vpop.xlane.xlu1 %442 }
 0x28a   :  { %825 = vrsqrt.f32 %v450_v35  ;;  %v447_v39 = vmul.f32 0.5, %v443_v38  ;;  %v222_v40 = vmul.f32 %v822_v36, %v206_v3  ;;  %v726_v38 = vpop.permute.xlu0 %725 }
 0x28c   :  { %v449_v42 = vadd.f32 1e-05, %v447_v39  ;;  %v234_v43 = vmul.f32 %v231_v41, %v222_v40 }
 0x28d   :  { %v824_v45 = vpop.eup %823  ;;  %v243_v46 = vpop.permute.xlu1 %242 }
 0x28e   :  { %827 = vrsqrt.f32 %v449_v42  ;;  %v246_v47 = vadd.f32 %v243_v46, %v234_v43  ;;  %v221_v48 = vmul.f32 %v824_v45, %v205_v5 }
 0x290   :  { %v248_v49 = vmax.f32 %v246_v47, 0.0  ;;  %v233_v50 = vmul.f32 %v226_v25, %v221_v48 }
 0x291   :  { %v257_v3 = vpop.permute.xlu1 %256 }
 0x292   :  { %783 = vmatprep.subr.mxu1 %v248_v49  ;;  %v245_v52 = vadd.f32 %v238_v51, %v233_v50 }
 0x293   :  { %784 = vmatpush3.msra.mxu1 %v248_v49 }
 0x294   :  { %v247_v53 = vmax.f32 %v245_v52, 0.0 }
 0x295   :  { %v721_v43 = vpop.permute.xlu1 %720 }
 0x296   :  { %785 = vmatprep.subr.mxu1 %v247_v53 }
 0x297   :  { %v826_v55 = vpop.eup %825  ;;  %786 = vmatpush3.msra.mxu1 %v247_v53 }
 0x298   :  { %v454_v56 = vmul.f32 %v826_v55, %v438_v12  ;;  %788 = vmatmul.mubr.msk.f32.vlgmr.msra.gmra.mxu1 %vm113_vm2, %v100_v54 }
 0x299   :  { %801 = vmatprep.mubr.msk.f32.mxu1 %vm113_vm2, %v99_v24 }
 0x29a   :  { %v456_v57 = vmul.f32 %v454_v56, %v231_v41 }
 0x29b   :  { %v828_v58 = vpop.eup %827 }
 0x29c   :  { %v458_v59 = vadd.f32 %v456_v57, %v243_v46  ;;  %v453_v60 = vmul.f32 %v828_v58, %v437_v16 }
 0x29e   :  { %v460_v61 = vmax.f32 %v458_v59, 0.0  ;;  %v455_v62 = vmul.f32 %v453_v60, %v226_v25 }
 0x2a0   :  { %797 = vmatprep.subr.mxu1 %v460_v61  ;;  %v457_v63 = vadd.f32 %v455_v62, %v238_v51 }
 0x2a1   :  { %798 = vmatpush3.msra.mxu1 %v460_v61 }
 0x2a2   :  { %v459_v0 = vmax.f32 %v457_v63, 0.0 }
 0x2a4   :  { %799 = vmatprep.subr.mxu1 %v459_v0 }
 0x2a5   :  { %800 = vmatpush3.msra.mxu1 %v459_v0 }
 0x2a6   :  { %802 = vmatmul.mubr.msk.f32.vlgmr.msra.gmra.mxu1 %vm113_vm2, %v100_v54 }
 0x2a7   :  { %815 = vmatprep.mubr.msk.f32.mxu1 %vm113_vm2, %v550_v1 }
 0x358   :  { %v789_v4 = vpop.f32.mrf.mxu1 }
 0x359   :  { %v337_v5 = vadd.f32 %v789_v4, %v257_v3 }
 0x35a   :  { %v331_v7 = vpop.f32.mrf.mxu1 }
 0x35b   :  { %v741_v8 = vmul.f32 -1.442695, %v337_v5  ;;  %v332_v9 = vadd.f32 %v331_v7, %v252_v6 }
 0x35d   :  { %829 = vpow2.f32 %v741_v8  ;;  %v740_v10 = vmul.f32 -1.442695, %v332_v9 }
 0x35f   :  { %831 = vpow2.f32 %v740_v10 }
 0x366   :  { %v803_v11 = vpop.f32.mrf.mxu1 }
 0x367   :  { %v533_v12 = vadd.f32 %v803_v11, %v257_v3 }
 0x368   :  { %v527_v13 = vpop.f32.mrf.mxu1 }
 0x369   :  { %v747_v14 = vmul.f32 -1.442695, %v533_v12  ;;  %v528_v15 = vadd.f32 %v527_v13, %v252_v6 }
 0x36a   :  { %v830_v16 = vpop.eup %829 }
 0x36b   :  { %v347_v17 = vadd.f32 1.0, %v830_v16  ;;  %833 = vpow2.f32 %v747_v14  ;;  %v746_v18 = vmul.f32 -1.442695, %v528_v15 }
 0x36c   :  { %v832_v19 = vpop.eup %831 }
 0x36d   :  { %835 = vrcp.f32 %v347_v17  ;;  %v346_v20 = vadd.f32 1.0, %v832_v19 }
 0x36e   :  { %837 = vpow2.f32 %v746_v18 }
 0x36f   :  { %839 = vrcp.f32 %v346_v20 }
 0x378   :  { %v834_v21 = vpop.eup %833 }
 0x379   :  { %v543_v23 = vadd.f32 1.0, %v834_v21 }
 0x37a   :  { %v836_v24 = vpop.eup %835 }
 0x37b   :  { %v838_v25 = vpop.eup %837  ;;  %841 = vrcp.f32 %v543_v23  ;;  %v353_v26 = vmul.f32 %v836_v24, %v928_v22 }
 0x37c   :  { %v840_v27 = vpop.eup %839  ;;  %v542_v29 = vadd.f32 1.0, %v838_v25 }
 0x37d   :  { %811 = vmatprep.subr.mxu1 %v353_v26  ;;  %v352_v30 = vmul.f32 %v840_v27, %v933_v28  ;;  %v553_v28 = vld [vmem:[%s1032_s8 + $0x8] sm:$0xff] }
 0x37e   :  { %843 = vrcp.f32 %v542_v29  ;;  %812 = vmatpush3.msra.mxu1 %v353_v26 }
 0x37f   :  { %813 = vmatprep.subr.mxu1 %v352_v30 }
 0x380   :  { %814 = vmatpush3.msra.mxu1 %v352_v30 }
 0x381   :  { %816 = vmatmul.mubr.msk.f32.vlgmr.msra.gmra.mxu1 %vm113_vm2, %v551_v31 }
 0x388   :  { %v842_v32 = vpop.eup %841 }
 0x389   :  { %v549_v33 = vmul.f32 %v842_v32, %v943_v37 }
 0x38b   :  { %v844_v34 = vpop.eup %843  ;;  %804 = vmatprep.subr.mxu0 %v549_v33 }
 0x38c   :  { %805 = vmatpush3.msra.mxu0 %v549_v33  ;;  %v548_v22 = vmul.f32 %v844_v34, %v948_v44 }
 0x38e   :  { %806 = vmatprep.subr.mxu0 %v548_v22 }
 0x38f   :  { %807 = vmatpush3.msra.mxu0 %v548_v22 }
 0x390   :  { %809 = vmatmul.mubr.msk.f32.vlgmr.msra.gmra.mxu0 %vm113_vm2, %v553_v28 }
 0x441   :  { %v817_v35 = vpop.f32.mrf.mxu1 }
 0x443   :  { %v707_v40 = vpop.f32.mrf.mxu1 }
 0x450   :  { %v810_v36 = vpop.f32.mrf.mxu0 }
 0x451   :  { %v713_v39 = vadd.f32 %v817_v35, %v810_v36 }
 0x452   :  { %v626_v41 = vpop.f32.mrf.mxu0 }
 0x453   :  { %v729_v37 = vadd.f32 %v726_v38, %v713_v39  ;;  %v708_v42 = vadd.f32 %v707_v40, %v626_v41 }
 0x455   :  { %731 = vst.msk [vmem:[%s1033_s10 + $0x8] sm:$0xff] %vm195_vm4, %v729_v37  ;;  %v728_v44 = vadd.f32 %v721_v43, %v708_v42 }
 0x457   :  { %730 = vst.msk [vmem:[%s1033_s10] sm:$0xff] %vm195_vm4, %v728_v44 }

</bundles_post_ra>
